<compile_context>
chip_gen: v6e
topology: v6e:2x2x1
jax: 0.10.0
libtpu: 0.0.40
codegen_flags: <defaults>
</compile_context>

<pallas_src>
import numpy as np
import jax
import jax.numpy as jnp
from jax.experimental import pallas as pl
from jax.experimental.pallas import tpu as pltpu


# ----------------------------------------------------------------------------
# Host-side (outside jit, run once): phase-fused weights + shift matrices
# ----------------------------------------------------------------------------
_CONV_SHIFTS = ((-1, -1), (-1, 0), (0, -1), (0, 0))     # stride-2 conv base-grid taps
_CONVT_SHIFTS = ((0, 0), (0, 1), (1, 0), (1, 1))        # stride-2 convT base-grid taps
_ALL_SHIFTS = tuple((di, dj) for di in (-1, 0, 1) for dj in (-1, 0, 1))


def _sid(di, dj):
    return (di + 1) * 3 + (dj + 1)


_CONV_SIDS = tuple(_sid(*s) for s in _CONV_SHIFTS)
_CONVT_SIDS = tuple(_sid(*s) for s in _CONVT_SHIFTS)
_LAYER_SIDS = (_CONV_SIDS, _CONV_SIDS, _CONVT_SIDS, _CONVT_SIDS)


def _shift_matrices(hb, wb):
    """S[k, src, dst] such that (x @ S[k])[:, (i,j)] = x[:, (i+di, j+dj)], 0 if OOB."""
    m = hb * wb
    s = np.zeros((9, m, m), np.float32)
    for k, (di, dj) in enumerate(_ALL_SHIFTS):
        for i in range(hb):
            for j in range(wb):
                si, sj = i + di, j + dj
                if 0 <= si < hb and 0 <= sj < wb:
                    s[k, si * wb + sj, i * wb + j] = 1.0
    return s


def _fuse_conv(w, b, pi):
    """Conv2d(Ci->Co, k=3, s=2, p=1): Pi-phase-blocked input -> Po=Pi//2-phase output.

    Output row (a, b, co), column (n, i, j) equals the conv output at spatial
    (Po*i + a, Po*j + b); tap kh reads input global row 2*(Po*i+a) + kh - 1, which is
    input phase p at base row i+di with  kh = Pi*di + p + 1 - 2a.
    """
    w = np.asarray(w, np.float32)                 # torch layout (Co, Ci, 3, 3)
    b = np.asarray(b, np.float32)
    co, ci = w.shape[0], w.shape[1]
    po = pi // 2
    ws = np.zeros((len(_CONV_SHIFTS), po * po * co, pi * pi * ci), np.float32)
    for a in range(po):
        for kh in range(3):
            di, p = divmod(2 * a + kh - 1, pi)
            for bb in range(po):
                for kw in range(3):
                    dj, q = divmod(2 * bb + kw - 1, pi)
                    t = _CONV_SHIFTS.index((di, dj))
                    r0 = (a * po + bb) * co
                    c0 = (p * pi + q) * ci
                    ws[t, r0:r0 + co, c0:c0 + ci] += w[:, :, kh, kw]
    return ws, np.tile(b, po * po)


def _fuse_convT(w, b, pi):
    """ConvTranspose2d(Ci->Co, k=3, s=2, p=1, op=1): Pi-phase input -> Po=2*Pi output.

    out[oh] = sum_{ih, kh : 2*ih + kh - 1 = oh} w[ci, co, kh] * in[ih]; with oh = Po*i + a
    and ih = Pi*(i+di) + p this gives contributions only when (a + 1 - kh) is even.
    """
    w = np.asarray(w, np.float32)                 # torch layout (Ci, Co, 3, 3)
    b = np.asarray(b, np.float32)
    ci, co = w.shape[0], w.shape[1]
    po = 2 * pi
    ws = np.zeros((len(_CONVT_SHIFTS), po * po * co, pi * pi * ci), np.float32)
    for a in range(po):
        for kh in range(3):
            if (a + 1 - kh) % 2:
                continue
            di, p = divmod((a + 1 - kh) // 2, pi)
            for bb in range(po):
                for kw in range(3):
                    if (bb + 1 - kw) % 2:
                        continue
                    dj, q = divmod((bb + 1 - kw) // 2, pi)
                    t = _CONVT_SHIFTS.index((di, dj))
                    r0 = (a * po + bb) * co
                    c0 = (p * pi + q) * ci
                    ws[t, r0:r0 + co, c0:c0 + ci] += w[:, :, kh, kw].T
    return ws, np.tile(b, po * po)


def prepare_params(layer_params, height, width):
    """One-time weight preprocessing, hoisted out of the jitted forward."""
    assert height % 4 == 0 and width % 4 == 0
    (w1, b1), (w2, b2), (w3, b3), (w4, b4) = layer_params
    fused = [
        _fuse_conv(w1, b1, pi=4),    # Conv2d(3, width)    : 16-phase input -> 4-phase
        _fuse_conv(w2, b2, pi=2),    # Conv2d(width, width): 4-phase -> base
        _fuse_convT(w3, b3, pi=1),   # ConvT(width, width) : base -> 4-phase
        _fuse_convT(w4, b4, pi=2),   # ConvT(width, 3)     : 4-phase -> 16-phase
    ]
    prep = {"s": jnp.asarray(_shift_matrices(height // 4, width // 4), jnp.bfloat16)}
    for idx, (ws, bias) in enumerate(fused):
        prep[f"w{idx}"] = jnp.asarray(ws, jnp.bfloat16)
        prep[f"b{idx}"] = jnp.asarray(bias.reshape(-1, 1), jnp.float32)
    return prep


# ----------------------------------------------------------------------------
# The fused whole-network Pallas kernel (one image per grid step)
# ----------------------------------------------------------------------------
def _slimcae_kernel(x_ref, s_ref, w0_ref, b0_ref, w1_ref, b1_ref, w2_ref, b2_ref,
                    w3_ref, b3_ref, o_ref):
    def layer(x, w_ref, b_ref, sids, act):
        r_out = w_ref.shape[1]
        m = x.shape[1]
        acc = jnp.zeros((r_out, m), jnp.float32)
        for t, sid in enumerate(sids):
            # Shift + boundary-mask the base-grid columns, then GEMM (f32 accumulate).
            xs = jnp.dot(x, s_ref[sid], preferred_element_type=jnp.float32)
            xs = xs.astype(jnp.bfloat16)           # exact: S is a 0/1 column selection
            acc = acc + jnp.dot(w_ref[t], xs, preferred_element_type=jnp.float32)
        acc = acc + b_ref[...]                     # (R_out, M) + (R_out, 1) broadcast
        if act == "relu":
            return jnp.maximum(acc, 0.0).astype(jnp.bfloat16)
        # numerically stable sigmoid; exact reciprocal keeps the output inside [0, 1]
        pos = acc >= 0.0
        z = jnp.exp(jnp.where(pos, -acc, acc))
        r = pl.reciprocal(1.0 + z)
        return jnp.where(pos, r, z * r)            # float32

    h = x_ref[0]                                   # (16*3, Hb*Wb) bf16, one image
    h = layer(h, w0_ref, b0_ref, _LAYER_SIDS[0], "relu")      # encoder conv 1
    h = layer(h, w1_ref, b1_ref, _LAYER_SIDS[1], "relu")      # encoder conv 2
    h = layer(h, w2_ref, b2_ref, _LAYER_SIDS[2], "relu")      # decoder deconv 1
    h = layer(h, w3_ref, b3_ref, _LAYER_SIDS[3], "sigmoid")   # decoder deconv 2
    o_ref[0] = h


def slimcae_forward(prep, x):
    n, c, h, w = x.shape
    assert c == 3 and h % 4 == 0 and w % 4 == 0
    hb, wb = h // 4, w // 4
    m = hb * wb

    # space-to-depth(4): only layout shuffle on the way in (3-channel boundary tensor)
    x0 = (x.reshape(n, 3, hb, 4, wb, 4)
            .transpose(0, 3, 5, 1, 2, 4)
            .reshape(n, 48, m)
            .astype(jnp.bfloat16))

    operands = [x0, prep["s"]]
    in_specs = [
        pl.BlockSpec((1, 48, m), lambda i: (i, 0, 0)),        # one image per grid step
        pl.BlockSpec(prep["s"].shape, lambda i: (0, 0, 0)),   # resident shift matrices
    ]
    flops = 0
    for idx in range(4):
        w_l, b_l = prep[f"w{idx}"], prep[f"b{idx}"]
        operands += [w_l, b_l]
        in_specs += [
            pl.BlockSpec(w_l.shape, lambda i: (0, 0, 0)),     # resident fused weights
            pl.BlockSpec(b_l.shape, lambda i: (0, 0)),        # resident bias
        ]
        _, r_out, r_in = w_l.shape
        flops += 4 * (2 * r_in * m * m + 2 * r_out * r_in * m)
    bytes_accessed = sum(int(np.prod(o.shape)) * o.dtype.itemsize for o in operands)
    bytes_accessed += n * 48 * m * 4

    out_pb = pl.pallas_call(
        _slimcae_kernel,
        out_shape=jax.ShapeDtypeStruct((n, 48, m), jnp.float32),
        grid=(n,),
        in_specs=in_specs,
        out_specs=pl.BlockSpec((1, 48, m), lambda i: (i, 0, 0)),
        compiler_params=pltpu.CompilerParams(dimension_semantics=("parallel",)),
        cost_estimate=pl.CostEstimate(
            flops=n * flops,
            transcendentals=n * 48 * m,
            bytes_accessed=int(bytes_accessed)),
    )(*operands)

    # depth-to-space(4): only layout shuffle on the way out (3-channel boundary tensor)
    return (out_pb.reshape(n, 4, 4, 3, hb, wb)
                  .transpose(0, 3, 4, 1, 5, 2)
                  .reshape(n, 3, h, w))


# ----------------------------------------------------------------------------
# PyTorch-style parameter init + pure-XLA reference (for a correctness check)
# ----------------------------------------------------------------------------
def _init_conv(key, cout, cin, k=3):
    fan_in = cin * k * k
    bound = float(1.0 / np.sqrt(fan_in))
    kw_, kb_ = jax.random.split(key)
    w = jax.random.uniform(kw_, (cout, cin, k, k), jnp.float32, -bound, bound)
    b = jax.random.uniform(kb_, (cout,), jnp.float32, -bound, bound)
    return w, b


def _init_convT(key, cin, cout, k=3):
    fan_in = cout * k * k        # PyTorch uses weight.size(1)*k*k for ConvTranspose2d
    bound = float(1.0 / np.sqrt(fan_in))
    kw_, kb_ = jax.random.split(key)
    w = jax.random.uniform(kw_, (cin, cout, k, k), jnp.float32, -bound, bound)
    b = jax.random.uniform(kb_, (cout,), jnp.float32, -bound, bound)
    return w, b


def init_slimcae_params(key, widths):
    params = []
    for width in widths:
        key, k1, k2, k3, k4 = jax.random.split(key, 5)
        params.append((
            _init_conv(k1, width, 3),       # Conv2d(3, width, 3, s=2, p=1)
            _init_conv(k2, width, width),   # Conv2d(width, width, 3, s=2, p=1)
            _init_convT(k3, width, width),  # ConvTranspose2d(width, width, 3, 2, 1, 1)
            _init_convT(k4, width, 3),      # ConvTranspose2d(width, 3, 3, 2, 1, 1)
        ))
    return params


def slimcae_reference(layer_params, x):
    """Pure-XLA reference of the PyTorch module (used only for validation)."""
    (w1, b1), (w2, b2), (w3, b3), (w4, b4) = layer_params

    def conv(hh, w_, b_):
        y = jax.lax.conv_general_dilated(
            hh, w_, (2, 2), ((1, 1), (1, 1)),
            dimension_numbers=("NCHW", "OIHW", "NCHW"))
        return jax.nn.relu(y + b_.reshape(1, -1, 1, 1))

    def convt(hh, w_, b_, act):
        y = jax.lax.conv_general_dilated(
            hh, w_[:, :, ::-1, ::-1], (1, 1), ((1, 2), (1, 2)),
            lhs_dilation=(2, 2),
            dimension_numbers=("NCHW", "IOHW", "NCHW"))
        y = y + b_.reshape(1, -1, 1, 1)
        return jax.nn.relu(y) if act == "relu" else jax.nn.sigmoid(y)

    hh = conv(x, w1, b1)
    hh = conv(hh, w2, b2)
    hh = convt(hh, w3, b3, "relu")
    return convt(hh, w4, b4, "sigmoid")


# ----------------------------------------------------------------------------
if __name__ == "__main__":
    key = jax.random.PRNGKey(0)
    kx, kp = jax.random.split(key)

    widths = [8, 16]
    width_idx = 0
    n, h, w = 2, 16, 16

    x = jax.random.uniform(kx, (n, 3, h, w), jnp.float32)        # NCHW, like PyTorch
    torch_params = init_slimcae_params(kp, widths)
    prepared = [prepare_params(p, h, w) for p in torch_params]   # hoisted weight prep

    fwd = jax.jit(slimcae_forward)
    out = jax.block_until_ready(fwd(prepared[width_idx], x))

    assert out.shape == (n, 3, h, w), out.shape
    assert bool(jnp.all(jnp.isfinite(out)))
    assert bool(jnp.all((out >= 0.0) & (out <= 1.0)))            # sigmoid output range

    ref = slimcae_reference(torch_params[width_idx], x)
    max_err = float(jnp.max(jnp.abs(out - ref)))
    assert max_err < 5e-2, f"max abs err vs reference: {max_err}"
    print("KERNEL_OK")
</pallas_src>

<mosaic_0001>
module attributes {stable_mosaic.version = 11 : i64} {
  func.func @_slimcae_kernel(%arg0: i32, %arg1: memref<1x48x16xbf16, #tpu.memory_space<vmem>>, %arg2: memref<9x16x16xbf16, #tpu.memory_space<vmem>>, %arg3: memref<4x32x48xbf16, #tpu.memory_space<vmem>>, %arg4: memref<32x1xf32, #tpu.memory_space<vmem>>, %arg5: memref<4x8x32xbf16, #tpu.memory_space<vmem>>, %arg6: memref<8x1xf32, #tpu.memory_space<vmem>>, %arg7: memref<4x32x8xbf16, #tpu.memory_space<vmem>>, %arg8: memref<32x1xf32, #tpu.memory_space<vmem>>, %arg9: memref<4x48x32xbf16, #tpu.memory_space<vmem>>, %arg10: memref<48x1xf32, #tpu.memory_space<vmem>>, %arg11: memref<1x48x16xf32, #tpu.memory_space<vmem>>) attributes {dimension_semantics = [#tpu.dimension_semantics<parallel>], iteration_bounds = array<i64: 2>, scalar_prefetch = 0 : i64, scratch_operands = 0 : i64, tpu.core_type = #tpu.core_type<tc>, window_params = [{transform_indices = @transform_0, window_bounds = array<i64: 1, 48, 16>}, {pipeline_mode = #tpu.pipeline_mode<synchronous>, transform_indices = @transform_1, window_bounds = array<i64: 9, 16, 16>}, {pipeline_mode = #tpu.pipeline_mode<synchronous>, transform_indices = @transform_2, window_bounds = array<i64: 4, 32, 48>}, {pipeline_mode = #tpu.pipeline_mode<synchronous>, transform_indices = @transform_3, window_bounds = array<i64: 32, 1>}, {pipeline_mode = #tpu.pipeline_mode<synchronous>, transform_indices = @transform_4, window_bounds = array<i64: 4, 8, 32>}, {pipeline_mode = #tpu.pipeline_mode<synchronous>, transform_indices = @transform_5, window_bounds = array<i64: 8, 1>}, {pipeline_mode = #tpu.pipeline_mode<synchronous>, transform_indices = @transform_6, window_bounds = array<i64: 4, 32, 8>}, {pipeline_mode = #tpu.pipeline_mode<synchronous>, transform_indices = @transform_7, window_bounds = array<i64: 32, 1>}, {pipeline_mode = #tpu.pipeline_mode<synchronous>, transform_indices = @transform_8, window_bounds = array<i64: 4, 48, 32>}, {pipeline_mode = #tpu.pipeline_mode<synchronous>, transform_indices = @transform_9, window_bounds = array<i64: 48, 1>}, {transform_indices = @transform_10, window_bounds = array<i64: 1, 48, 16>}]} {
    %c0 = arith.constant 0 : index
    %c0_0 = arith.constant 0 : index
    %c0_1 = arith.constant 0 : index
    %0 = vector.load %arg1[%c0, %c0_0, %c0_1] : memref<1x48x16xbf16, #tpu.memory_space<vmem>>, vector<1x48x16xbf16>
    %1 = vector.shape_cast %0 : vector<1x48x16xbf16> to vector<48x16xbf16>
    %cst = arith.constant 0.000000e+00 : f32
    %2 = vector.broadcast %cst : f32 to vector<32x16xf32>
    %c0_2 = arith.constant 0 : index
    %c0_3 = arith.constant 0 : index
    %c0_4 = arith.constant 0 : index
    %3 = vector.load %arg2[%c0_2, %c0_3, %c0_4] : memref<9x16x16xbf16, #tpu.memory_space<vmem>>, vector<1x16x16xbf16>
    %4 = vector.shape_cast %3 : vector<1x16x16xbf16> to vector<16x16xbf16>
    %cst_5 = arith.constant dense<0.000000e+00> : vector<48x16xf32>
    %5 = tpu.matmul %1, %4, %cst_5 {dimension_numbers = #tpu.dot_dimension_numbers<[1], [0], [0], [1], [0, 0, 1, 1], [], []>} : vector<48x16xbf16>, vector<16x16xbf16>, vector<48x16xf32> -> vector<48x16xf32>
    %6 = arith.truncf %5 : vector<48x16xf32> to vector<48x16xbf16>
    %c0_6 = arith.constant 0 : index
    %c0_7 = arith.constant 0 : index
    %c0_8 = arith.constant 0 : index
    %7 = vector.load %arg3[%c0_6, %c0_7, %c0_8] : memref<4x32x48xbf16, #tpu.memory_space<vmem>>, vector<1x32x48xbf16>
    %8 = vector.shape_cast %7 : vector<1x32x48xbf16> to vector<32x48xbf16>
    %cst_9 = arith.constant dense<0.000000e+00> : vector<32x16xf32>
    %9 = tpu.matmul %8, %6, %cst_9 {dimension_numbers = #tpu.dot_dimension_numbers<[1], [0], [0], [1], [0, 0, 1, 1], [], []>} : vector<32x48xbf16>, vector<48x16xbf16>, vector<32x16xf32> -> vector<32x16xf32>
    %10 = arith.addf %2, %9 : vector<32x16xf32>
    %c1 = arith.constant 1 : index
    %c0_10 = arith.constant 0 : index
    %c0_11 = arith.constant 0 : index
    %11 = vector.load %arg2[%c1, %c0_10, %c0_11] : memref<9x16x16xbf16, #tpu.memory_space<vmem>>, vector<1x16x16xbf16>
    %12 = vector.shape_cast %11 : vector<1x16x16xbf16> to vector<16x16xbf16>
    %cst_12 = arith.constant dense<0.000000e+00> : vector<48x16xf32>
    %13 = tpu.matmul %1, %12, %cst_12 {dimension_numbers = #tpu.dot_dimension_numbers<[1], [0], [0], [1], [0, 0, 1, 1], [], []>} : vector<48x16xbf16>, vector<16x16xbf16>, vector<48x16xf32> -> vector<48x16xf32>
    %14 = arith.truncf %13 : vector<48x16xf32> to vector<48x16xbf16>
    %c1_13 = arith.constant 1 : index
    %c0_14 = arith.constant 0 : index
    %c0_15 = arith.constant 0 : index
    %15 = vector.load %arg3[%c1_13, %c0_14, %c0_15] : memref<4x32x48xbf16, #tpu.memory_space<vmem>>, vector<1x32x48xbf16>
    %16 = vector.shape_cast %15 : vector<1x32x48xbf16> to vector<32x48xbf16>
    %cst_16 = arith.constant dense<0.000000e+00> : vector<32x16xf32>
    %17 = tpu.matmul %16, %14, %cst_16 {dimension_numbers = #tpu.dot_dimension_numbers<[1], [0], [0], [1], [0, 0, 1, 1], [], []>} : vector<32x48xbf16>, vector<48x16xbf16>, vector<32x16xf32> -> vector<32x16xf32>
    %18 = arith.addf %10, %17 : vector<32x16xf32>
    %c3 = arith.constant 3 : index
    %c0_17 = arith.constant 0 : index
    %c0_18 = arith.constant 0 : index
    %19 = vector.load %arg2[%c3, %c0_17, %c0_18] : memref<9x16x16xbf16, #tpu.memory_space<vmem>>, vector<1x16x16xbf16>
    %20 = vector.shape_cast %19 : vector<1x16x16xbf16> to vector<16x16xbf16>
    %cst_19 = arith.constant dense<0.000000e+00> : vector<48x16xf32>
    %21 = tpu.matmul %1, %20, %cst_19 {dimension_numbers = #tpu.dot_dimension_numbers<[1], [0], [0], [1], [0, 0, 1, 1], [], []>} : vector<48x16xbf16>, vector<16x16xbf16>, vector<48x16xf32> -> vector<48x16xf32>
    %22 = arith.truncf %21 : vector<48x16xf32> to vector<48x16xbf16>
    %c2 = arith.constant 2 : index
    %c0_20 = arith.constant 0 : index
    %c0_21 = arith.constant 0 : index
    %23 = vector.load %arg3[%c2, %c0_20, %c0_21] : memref<4x32x48xbf16, #tpu.memory_space<vmem>>, vector<1x32x48xbf16>
    %24 = vector.shape_cast %23 : vector<1x32x48xbf16> to vector<32x48xbf16>
    %cst_22 = arith.constant dense<0.000000e+00> : vector<32x16xf32>
    %25 = tpu.matmul %24, %22, %cst_22 {dimension_numbers = #tpu.dot_dimension_numbers<[1], [0], [0], [1], [0, 0, 1, 1], [], []>} : vector<32x48xbf16>, vector<48x16xbf16>, vector<32x16xf32> -> vector<32x16xf32>
    %26 = arith.addf %18, %25 : vector<32x16xf32>
    %c4 = arith.constant 4 : index
    %c0_23 = arith.constant 0 : index
    %c0_24 = arith.constant 0 : index
    %27 = vector.load %arg2[%c4, %c0_23, %c0_24] : memref<9x16x16xbf16, #tpu.memory_space<vmem>>, vector<1x16x16xbf16>
    %28 = vector.shape_cast %27 : vector<1x16x16xbf16> to vector<16x16xbf16>
    %cst_25 = arith.constant dense<0.000000e+00> : vector<48x16xf32>
    %29 = tpu.matmul %1, %28, %cst_25 {dimension_numbers = #tpu.dot_dimension_numbers<[1], [0], [0], [1], [0, 0, 1, 1], [], []>} : vector<48x16xbf16>, vector<16x16xbf16>, vector<48x16xf32> -> vector<48x16xf32>
    %30 = arith.truncf %29 : vector<48x16xf32> to vector<48x16xbf16>
    %c3_26 = arith.constant 3 : index
    %c0_27 = arith.constant 0 : index
    %c0_28 = arith.constant 0 : index
    %31 = vector.load %arg3[%c3_26, %c0_27, %c0_28] : memref<4x32x48xbf16, #tpu.memory_space<vmem>>, vector<1x32x48xbf16>
    %32 = vector.shape_cast %31 : vector<1x32x48xbf16> to vector<32x48xbf16>
    %cst_29 = arith.constant dense<0.000000e+00> : vector<32x16xf32>
    %33 = tpu.matmul %32, %30, %cst_29 {dimension_numbers = #tpu.dot_dimension_numbers<[1], [0], [0], [1], [0, 0, 1, 1], [], []>} : vector<32x48xbf16>, vector<48x16xbf16>, vector<32x16xf32> -> vector<32x16xf32>
    %34 = arith.addf %26, %33 : vector<32x16xf32>
    %c0_30 = arith.constant 0 : index
    %c0_31 = arith.constant 0 : index
    %35 = vector.load %arg4[%c0_30, %c0_31] : memref<32x1xf32, #tpu.memory_space<vmem>>, vector<32x1xf32>
    %36 = vector.broadcast %35 : vector<32x1xf32> to vector<32x16xf32>
    %37 = arith.addf %34, %36 : vector<32x16xf32>
    %cst_32 = arith.constant 0.000000e+00 : f32
    %38 = vector.broadcast %cst_32 : f32 to vector<32x16xf32>
    %39 = arith.maximumf %37, %38 : vector<32x16xf32>
    %40 = arith.truncf %39 : vector<32x16xf32> to vector<32x16xbf16>
    %cst_33 = arith.constant 0.000000e+00 : f32
    %41 = vector.broadcast %cst_33 : f32 to vector<8x16xf32>
    %c0_34 = arith.constant 0 : index
    %c0_35 = arith.constant 0 : index
    %c0_36 = arith.constant 0 : index
    %42 = vector.load %arg2[%c0_34, %c0_35, %c0_36] : memref<9x16x16xbf16, #tpu.memory_space<vmem>>, vector<1x16x16xbf16>
    %43 = vector.shape_cast %42 : vector<1x16x16xbf16> to vector<16x16xbf16>
    %cst_37 = arith.constant dense<0.000000e+00> : vector<32x16xf32>
    %44 = tpu.matmul %40, %43, %cst_37 {dimension_numbers = #tpu.dot_dimension_numbers<[1], [0], [0], [1], [0, 0, 1, 1], [], []>} : vector<32x16xbf16>, vector<16x16xbf16>, vector<32x16xf32> -> vector<32x16xf32>
    %45 = arith.truncf %44 : vector<32x16xf32> to vector<32x16xbf16>
    %c0_38 = arith.constant 0 : index
    %c0_39 = arith.constant 0 : index
    %c0_40 = arith.constant 0 : index
    %46 = vector.load %arg5[%c0_38, %c0_39, %c0_40] : memref<4x8x32xbf16, #tpu.memory_space<vmem>>, vector<1x8x32xbf16>
    %47 = vector.shape_cast %46 : vector<1x8x32xbf16> to vector<8x32xbf16>
    %cst_41 = arith.constant dense<0.000000e+00> : vector<8x16xf32>
    %48 = tpu.matmul %47, %45, %cst_41 {dimension_numbers = #tpu.dot_dimension_numbers<[1], [0], [0], [1], [0, 0, 1, 1], [], []>} : vector<8x32xbf16>, vector<32x16xbf16>, vector<8x16xf32> -> vector<8x16xf32>
    %49 = arith.addf %41, %48 : vector<8x16xf32>
    %c1_42 = arith.constant 1 : index
    %c0_43 = arith.constant 0 : index
    %c0_44 = arith.constant 0 : index
    %50 = vector.load %arg2[%c1_42, %c0_43, %c0_44] : memref<9x16x16xbf16, #tpu.memory_space<vmem>>, vector<1x16x16xbf16>
    %51 = vector.shape_cast %50 : vector<1x16x16xbf16> to vector<16x16xbf16>
    %cst_45 = arith.constant dense<0.000000e+00> : vector<32x16xf32>
    %52 = tpu.matmul %40, %51, %cst_45 {dimension_numbers = #tpu.dot_dimension_numbers<[1], [0], [0], [1], [0, 0, 1, 1], [], []>} : vector<32x16xbf16>, vector<16x16xbf16>, vector<32x16xf32> -> vector<32x16xf32>
    %53 = arith.truncf %52 : vector<32x16xf32> to vector<32x16xbf16>
    %c1_46 = arith.constant 1 : index
    %c0_47 = arith.constant 0 : index
    %c0_48 = arith.constant 0 : index
    %54 = vector.load %arg5[%c1_46, %c0_47, %c0_48] : memref<4x8x32xbf16, #tpu.memory_space<vmem>>, vector<1x8x32xbf16>
    %55 = vector.shape_cast %54 : vector<1x8x32xbf16> to vector<8x32xbf16>
    %cst_49 = arith.constant dense<0.000000e+00> : vector<8x16xf32>
    %56 = tpu.matmul %55, %53, %cst_49 {dimension_numbers = #tpu.dot_dimension_numbers<[1], [0], [0], [1], [0, 0, 1, 1], [], []>} : vector<8x32xbf16>, vector<32x16xbf16>, vector<8x16xf32> -> vector<8x16xf32>
    %57 = arith.addf %49, %56 : vector<8x16xf32>
    %c3_50 = arith.constant 3 : index
    %c0_51 = arith.constant 0 : index
    %c0_52 = arith.constant 0 : index
    %58 = vector.load %arg2[%c3_50, %c0_51, %c0_52] : memref<9x16x16xbf16, #tpu.memory_space<vmem>>, vector<1x16x16xbf16>
    %59 = vector.shape_cast %58 : vector<1x16x16xbf16> to vector<16x16xbf16>
    %cst_53 = arith.constant dense<0.000000e+00> : vector<32x16xf32>
    %60 = tpu.matmul %40, %59, %cst_53 {dimension_numbers = #tpu.dot_dimension_numbers<[1], [0], [0], [1], [0, 0, 1, 1], [], []>} : vector<32x16xbf16>, vector<16x16xbf16>, vector<32x16xf32> -> vector<32x16xf32>
    %61 = arith.truncf %60 : vector<32x16xf32> to vector<32x16xbf16>
    %c2_54 = arith.constant 2 : index
    %c0_55 = arith.constant 0 : index
    %c0_56 = arith.constant 0 : index
    %62 = vector.load %arg5[%c2_54, %c0_55, %c0_56] : memref<4x8x32xbf16, #tpu.memory_space<vmem>>, vector<1x8x32xbf16>
    %63 = vector.shape_cast %62 : vector<1x8x32xbf16> to vector<8x32xbf16>
    %cst_57 = arith.constant dense<0.000000e+00> : vector<8x16xf32>
    %64 = tpu.matmul %63, %61, %cst_57 {dimension_numbers = #tpu.dot_dimension_numbers<[1], [0], [0], [1], [0, 0, 1, 1], [], []>} : vector<8x32xbf16>, vector<32x16xbf16>, vector<8x16xf32> -> vector<8x16xf32>
    %65 = arith.addf %57, %64 : vector<8x16xf32>
    %c4_58 = arith.constant 4 : index
    %c0_59 = arith.constant 0 : index
    %c0_60 = arith.constant 0 : index
    %66 = vector.load %arg2[%c4_58, %c0_59, %c0_60] : memref<9x16x16xbf16, #tpu.memory_space<vmem>>, vector<1x16x16xbf16>
    %67 = vector.shape_cast %66 : vector<1x16x16xbf16> to vector<16x16xbf16>
    %cst_61 = arith.constant dense<0.000000e+00> : vector<32x16xf32>
    %68 = tpu.matmul %40, %67, %cst_61 {dimension_numbers = #tpu.dot_dimension_numbers<[1], [0], [0], [1], [0, 0, 1, 1], [], []>} : vector<32x16xbf16>, vector<16x16xbf16>, vector<32x16xf32> -> vector<32x16xf32>
    %69 = arith.truncf %68 : vector<32x16xf32> to vector<32x16xbf16>
    %c3_62 = arith.constant 3 : index
    %c0_63 = arith.constant 0 : index
    %c0_64 = arith.constant 0 : index
    %70 = vector.load %arg5[%c3_62, %c0_63, %c0_64] : memref<4x8x32xbf16, #tpu.memory_space<vmem>>, vector<1x8x32xbf16>
    %71 = vector.shape_cast %70 : vector<1x8x32xbf16> to vector<8x32xbf16>
    %cst_65 = arith.constant dense<0.000000e+00> : vector<8x16xf32>
    %72 = tpu.matmul %71, %69, %cst_65 {dimension_numbers = #tpu.dot_dimension_numbers<[1], [0], [0], [1], [0, 0, 1, 1], [], []>} : vector<8x32xbf16>, vector<32x16xbf16>, vector<8x16xf32> -> vector<8x16xf32>
    %73 = arith.addf %65, %72 : vector<8x16xf32>
    %c0_66 = arith.constant 0 : index
    %c0_67 = arith.constant 0 : index
    %74 = vector.load %arg6[%c0_66, %c0_67] : memref<8x1xf32, #tpu.memory_space<vmem>>, vector<8x1xf32>
    %75 = vector.broadcast %74 : vector<8x1xf32> to vector<8x16xf32>
    %76 = arith.addf %73, %75 : vector<8x16xf32>
    %cst_68 = arith.constant 0.000000e+00 : f32
    %77 = vector.broadcast %cst_68 : f32 to vector<8x16xf32>
    %78 = arith.maximumf %76, %77 : vector<8x16xf32>
    %79 = arith.truncf %78 : vector<8x16xf32> to vector<8x16xbf16>
    %cst_69 = arith.constant 0.000000e+00 : f32
    %80 = vector.broadcast %cst_69 : f32 to vector<32x16xf32>
    %c4_70 = arith.constant 4 : index
    %c0_71 = arith.constant 0 : index
    %c0_72 = arith.constant 0 : index
    %81 = vector.load %arg2[%c4_70, %c0_71, %c0_72] : memref<9x16x16xbf16, #tpu.memory_space<vmem>>, vector<1x16x16xbf16>
    %82 = vector.shape_cast %81 : vector<1x16x16xbf16> to vector<16x16xbf16>
    %cst_73 = arith.constant dense<0.000000e+00> : vector<8x16xf32>
    %83 = tpu.matmul %79, %82, %cst_73 {dimension_numbers = #tpu.dot_dimension_numbers<[1], [0], [0], [1], [0, 0, 1, 1], [], []>} : vector<8x16xbf16>, vector<16x16xbf16>, vector<8x16xf32> -> vector<8x16xf32>
    %84 = arith.truncf %83 : vector<8x16xf32> to vector<8x16xbf16>
    %c0_74 = arith.constant 0 : index
    %c0_75 = arith.constant 0 : index
    %c0_76 = arith.constant 0 : index
    %85 = vector.load %arg7[%c0_74, %c0_75, %c0_76] : memref<4x32x8xbf16, #tpu.memory_space<vmem>>, vector<1x32x8xbf16>
    %86 = vector.shape_cast %85 : vector<1x32x8xbf16> to vector<32x8xbf16>
    %cst_77 = arith.constant dense<0.000000e+00> : vector<32x16xf32>
    %87 = tpu.matmul %86, %84, %cst_77 {dimension_numbers = #tpu.dot_dimension_numbers<[1], [0], [0], [1], [0, 0, 1, 1], [], []>} : vector<32x8xbf16>, vector<8x16xbf16>, vector<32x16xf32> -> vector<32x16xf32>
    %88 = arith.addf %80, %87 : vector<32x16xf32>
    %c5 = arith.constant 5 : index
    %c0_78 = arith.constant 0 : index
    %c0_79 = arith.constant 0 : index
    %89 = vector.load %arg2[%c5, %c0_78, %c0_79] : memref<9x16x16xbf16, #tpu.memory_space<vmem>>, vector<1x16x16xbf16>
    %90 = vector.shape_cast %89 : vector<1x16x16xbf16> to vector<16x16xbf16>
    %cst_80 = arith.constant dense<0.000000e+00> : vector<8x16xf32>
    %91 = tpu.matmul %79, %90, %cst_80 {dimension_numbers = #tpu.dot_dimension_numbers<[1], [0], [0], [1], [0, 0, 1, 1], [], []>} : vector<8x16xbf16>, vector<16x16xbf16>, vector<8x16xf32> -> vector<8x16xf32>
    %92 = arith.truncf %91 : vector<8x16xf32> to vector<8x16xbf16>
    %c1_81 = arith.constant 1 : index
    %c0_82 = arith.constant 0 : index
    %c0_83 = arith.constant 0 : index
    %93 = vector.load %arg7[%c1_81, %c0_82, %c0_83] : memref<4x32x8xbf16, #tpu.memory_space<vmem>>, vector<1x32x8xbf16>
    %94 = vector.shape_cast %93 : vector<1x32x8xbf16> to vector<32x8xbf16>
    %cst_84 = arith.constant dense<0.000000e+00> : vector<32x16xf32>
    %95 = tpu.matmul %94, %92, %cst_84 {dimension_numbers = #tpu.dot_dimension_numbers<[1], [0], [0], [1], [0, 0, 1, 1], [], []>} : vector<32x8xbf16>, vector<8x16xbf16>, vector<32x16xf32> -> vector<32x16xf32>
    %96 = arith.addf %88, %95 : vector<32x16xf32>
    %c7 = arith.constant 7 : index
    %c0_85 = arith.constant 0 : index
    %c0_86 = arith.constant 0 : index
    %97 = vector.load %arg2[%c7, %c0_85, %c0_86] : memref<9x16x16xbf16, #tpu.memory_space<vmem>>, vector<1x16x16xbf16>
    %98 = vector.shape_cast %97 : vector<1x16x16xbf16> to vector<16x16xbf16>
    %cst_87 = arith.constant dense<0.000000e+00> : vector<8x16xf32>
    %99 = tpu.matmul %79, %98, %cst_87 {dimension_numbers = #tpu.dot_dimension_numbers<[1], [0], [0], [1], [0, 0, 1, 1], [], []>} : vector<8x16xbf16>, vector<16x16xbf16>, vector<8x16xf32> -> vector<8x16xf32>
    %100 = arith.truncf %99 : vector<8x16xf32> to vector<8x16xbf16>
    %c2_88 = arith.constant 2 : index
    %c0_89 = arith.constant 0 : index
    %c0_90 = arith.constant 0 : index
    %101 = vector.load %arg7[%c2_88, %c0_89, %c0_90] : memref<4x32x8xbf16, #tpu.memory_space<vmem>>, vector<1x32x8xbf16>
    %102 = vector.shape_cast %101 : vector<1x32x8xbf16> to vector<32x8xbf16>
    %cst_91 = arith.constant dense<0.000000e+00> : vector<32x16xf32>
    %103 = tpu.matmul %102, %100, %cst_91 {dimension_numbers = #tpu.dot_dimension_numbers<[1], [0], [0], [1], [0, 0, 1, 1], [], []>} : vector<32x8xbf16>, vector<8x16xbf16>, vector<32x16xf32> -> vector<32x16xf32>
    %104 = arith.addf %96, %103 : vector<32x16xf32>
    %c8 = arith.constant 8 : index
    %c0_92 = arith.constant 0 : index
    %c0_93 = arith.constant 0 : index
    %105 = vector.load %arg2[%c8, %c0_92, %c0_93] : memref<9x16x16xbf16, #tpu.memory_space<vmem>>, vector<1x16x16xbf16>
    %106 = vector.shape_cast %105 : vector<1x16x16xbf16> to vector<16x16xbf16>
    %cst_94 = arith.constant dense<0.000000e+00> : vector<8x16xf32>
    %107 = tpu.matmul %79, %106, %cst_94 {dimension_numbers = #tpu.dot_dimension_numbers<[1], [0], [0], [1], [0, 0, 1, 1], [], []>} : vector<8x16xbf16>, vector<16x16xbf16>, vector<8x16xf32> -> vector<8x16xf32>
    %108 = arith.truncf %107 : vector<8x16xf32> to vector<8x16xbf16>
    %c3_95 = arith.constant 3 : index
    %c0_96 = arith.constant 0 : index
    %c0_97 = arith.constant 0 : index
    %109 = vector.load %arg7[%c3_95, %c0_96, %c0_97] : memref<4x32x8xbf16, #tpu.memory_space<vmem>>, vector<1x32x8xbf16>
    %110 = vector.shape_cast %109 : vector<1x32x8xbf16> to vector<32x8xbf16>
    %cst_98 = arith.constant dense<0.000000e+00> : vector<32x16xf32>
    %111 = tpu.matmul %110, %108, %cst_98 {dimension_numbers = #tpu.dot_dimension_numbers<[1], [0], [0], [1], [0, 0, 1, 1], [], []>} : vector<32x8xbf16>, vector<8x16xbf16>, vector<32x16xf32> -> vector<32x16xf32>
    %112 = arith.addf %104, %111 : vector<32x16xf32>
    %c0_99 = arith.constant 0 : index
    %c0_100 = arith.constant 0 : index
    %113 = vector.load %arg8[%c0_99, %c0_100] : memref<32x1xf32, #tpu.memory_space<vmem>>, vector<32x1xf32>
    %114 = vector.broadcast %113 : vector<32x1xf32> to vector<32x16xf32>
    %115 = arith.addf %112, %114 : vector<32x16xf32>
    %cst_101 = arith.constant 0.000000e+00 : f32
    %116 = vector.broadcast %cst_101 : f32 to vector<32x16xf32>
    %117 = arith.maximumf %115, %116 : vector<32x16xf32>
    %118 = arith.truncf %117 : vector<32x16xf32> to vector<32x16xbf16>
    %cst_102 = arith.constant 0.000000e+00 : f32
    %119 = vector.broadcast %cst_102 : f32 to vector<48x16xf32>
    %c4_103 = arith.constant 4 : index
    %c0_104 = arith.constant 0 : index
    %c0_105 = arith.constant 0 : index
    %120 = vector.load %arg2[%c4_103, %c0_104, %c0_105] : memref<9x16x16xbf16, #tpu.memory_space<vmem>>, vector<1x16x16xbf16>
    %121 = vector.shape_cast %120 : vector<1x16x16xbf16> to vector<16x16xbf16>
    %cst_106 = arith.constant dense<0.000000e+00> : vector<32x16xf32>
    %122 = tpu.matmul %118, %121, %cst_106 {dimension_numbers = #tpu.dot_dimension_numbers<[1], [0], [0], [1], [0, 0, 1, 1], [], []>} : vector<32x16xbf16>, vector<16x16xbf16>, vector<32x16xf32> -> vector<32x16xf32>
    %123 = arith.truncf %122 : vector<32x16xf32> to vector<32x16xbf16>
    %c0_107 = arith.constant 0 : index
    %c0_108 = arith.constant 0 : index
    %c0_109 = arith.constant 0 : index
    %124 = vector.load %arg9[%c0_107, %c0_108, %c0_109] : memref<4x48x32xbf16, #tpu.memory_space<vmem>>, vector<1x48x32xbf16>
    %125 = vector.shape_cast %124 : vector<1x48x32xbf16> to vector<48x32xbf16>
    %cst_110 = arith.constant dense<0.000000e+00> : vector<48x16xf32>
    %126 = tpu.matmul %125, %123, %cst_110 {dimension_numbers = #tpu.dot_dimension_numbers<[1], [0], [0], [1], [0, 0, 1, 1], [], []>} : vector<48x32xbf16>, vector<32x16xbf16>, vector<48x16xf32> -> vector<48x16xf32>
    %127 = arith.addf %119, %126 : vector<48x16xf32>
    %c5_111 = arith.constant 5 : index
    %c0_112 = arith.constant 0 : index
    %c0_113 = arith.constant 0 : index
    %128 = vector.load %arg2[%c5_111, %c0_112, %c0_113] : memref<9x16x16xbf16, #tpu.memory_space<vmem>>, vector<1x16x16xbf16>
    %129 = vector.shape_cast %128 : vector<1x16x16xbf16> to vector<16x16xbf16>
    %cst_114 = arith.constant dense<0.000000e+00> : vector<32x16xf32>
    %130 = tpu.matmul %118, %129, %cst_114 {dimension_numbers = #tpu.dot_dimension_numbers<[1], [0], [0], [1], [0, 0, 1, 1], [], []>} : vector<32x16xbf16>, vector<16x16xbf16>, vector<32x16xf32> -> vector<32x16xf32>
    %131 = arith.truncf %130 : vector<32x16xf32> to vector<32x16xbf16>
    %c1_115 = arith.constant 1 : index
    %c0_116 = arith.constant 0 : index
    %c0_117 = arith.constant 0 : index
    %132 = vector.load %arg9[%c1_115, %c0_116, %c0_117] : memref<4x48x32xbf16, #tpu.memory_space<vmem>>, vector<1x48x32xbf16>
    %133 = vector.shape_cast %132 : vector<1x48x32xbf16> to vector<48x32xbf16>
    %cst_118 = arith.constant dense<0.000000e+00> : vector<48x16xf32>
    %134 = tpu.matmul %133, %131, %cst_118 {dimension_numbers = #tpu.dot_dimension_numbers<[1], [0], [0], [1], [0, 0, 1, 1], [], []>} : vector<48x32xbf16>, vector<32x16xbf16>, vector<48x16xf32> -> vector<48x16xf32>
    %135 = arith.addf %127, %134 : vector<48x16xf32>
    %c7_119 = arith.constant 7 : index
    %c0_120 = arith.constant 0 : index
    %c0_121 = arith.constant 0 : index
    %136 = vector.load %arg2[%c7_119, %c0_120, %c0_121] : memref<9x16x16xbf16, #tpu.memory_space<vmem>>, vector<1x16x16xbf16>
    %137 = vector.shape_cast %136 : vector<1x16x16xbf16> to vector<16x16xbf16>
    %cst_122 = arith.constant dense<0.000000e+00> : vector<32x16xf32>
    %138 = tpu.matmul %118, %137, %cst_122 {dimension_numbers = #tpu.dot_dimension_numbers<[1], [0], [0], [1], [0, 0, 1, 1], [], []>} : vector<32x16xbf16>, vector<16x16xbf16>, vector<32x16xf32> -> vector<32x16xf32>
    %139 = arith.truncf %138 : vector<32x16xf32> to vector<32x16xbf16>
    %c2_123 = arith.constant 2 : index
    %c0_124 = arith.constant 0 : index
    %c0_125 = arith.constant 0 : index
    %140 = vector.load %arg9[%c2_123, %c0_124, %c0_125] : memref<4x48x32xbf16, #tpu.memory_space<vmem>>, vector<1x48x32xbf16>
    %141 = vector.shape_cast %140 : vector<1x48x32xbf16> to vector<48x32xbf16>
    %cst_126 = arith.constant dense<0.000000e+00> : vector<48x16xf32>
    %142 = tpu.matmul %141, %139, %cst_126 {dimension_numbers = #tpu.dot_dimension_numbers<[1], [0], [0], [1], [0, 0, 1, 1], [], []>} : vector<48x32xbf16>, vector<32x16xbf16>, vector<48x16xf32> -> vector<48x16xf32>
    %143 = arith.addf %135, %142 : vector<48x16xf32>
    %c8_127 = arith.constant 8 : index
    %c0_128 = arith.constant 0 : index
    %c0_129 = arith.constant 0 : index
    %144 = vector.load %arg2[%c8_127, %c0_128, %c0_129] : memref<9x16x16xbf16, #tpu.memory_space<vmem>>, vector<1x16x16xbf16>
    %145 = vector.shape_cast %144 : vector<1x16x16xbf16> to vector<16x16xbf16>
    %cst_130 = arith.constant dense<0.000000e+00> : vector<32x16xf32>
    %146 = tpu.matmul %118, %145, %cst_130 {dimension_numbers = #tpu.dot_dimension_numbers<[1], [0], [0], [1], [0, 0, 1, 1], [], []>} : vector<32x16xbf16>, vector<16x16xbf16>, vector<32x16xf32> -> vector<32x16xf32>
    %147 = arith.truncf %146 : vector<32x16xf32> to vector<32x16xbf16>
    %c3_131 = arith.constant 3 : index
    %c0_132 = arith.constant 0 : index
    %c0_133 = arith.constant 0 : index
    %148 = vector.load %arg9[%c3_131, %c0_132, %c0_133] : memref<4x48x32xbf16, #tpu.memory_space<vmem>>, vector<1x48x32xbf16>
    %149 = vector.shape_cast %148 : vector<1x48x32xbf16> to vector<48x32xbf16>
    %cst_134 = arith.constant dense<0.000000e+00> : vector<48x16xf32>
    %150 = tpu.matmul %149, %147, %cst_134 {dimension_numbers = #tpu.dot_dimension_numbers<[1], [0], [0], [1], [0, 0, 1, 1], [], []>} : vector<48x32xbf16>, vector<32x16xbf16>, vector<48x16xf32> -> vector<48x16xf32>
    %151 = arith.addf %143, %150 : vector<48x16xf32>
    %c0_135 = arith.constant 0 : index
    %c0_136 = arith.constant 0 : index
    %152 = vector.load %arg10[%c0_135, %c0_136] : memref<48x1xf32, #tpu.memory_space<vmem>>, vector<48x1xf32>
    %153 = vector.broadcast %152 : vector<48x1xf32> to vector<48x16xf32>
    %154 = arith.addf %151, %153 : vector<48x16xf32>
    %cst_137 = arith.constant 0.000000e+00 : f32
    %155 = vector.broadcast %cst_137 : f32 to vector<48x16xf32>
    %156 = arith.cmpf oge, %154, %155 : vector<48x16xf32>
    %cst_138 = arith.constant 0.000000e+00 : f32
    %157 = vector.broadcast %cst_138 : f32 to vector<48x16xf32>
    %158 = arith.subf %157, %154 : vector<48x16xf32>
    %159 = arith.select %156, %158, %154 : vector<48x16xi1>, vector<48x16xf32>
    %160 = math.exp %159 : vector<48x16xf32>
    %cst_139 = arith.constant 1.000000e+00 : f32
    %161 = vector.broadcast %cst_139 : f32 to vector<48x16xf32>
    %162 = arith.addf %161, %160 : vector<48x16xf32>
    %163 = tpu.reciprocal %162 : vector<48x16xf32> -> vector<48x16xf32>
    %164 = arith.mulf %160, %163 : vector<48x16xf32>
    %165 = arith.select %156, %163, %164 : vector<48x16xi1>, vector<48x16xf32>
    %c0_140 = arith.constant 0 : index
    %c0_141 = arith.constant 0 : index
    %c0_142 = arith.constant 0 : index
    %166 = vector.load %arg11[%c0_140, %c0_141, %c0_142] : memref<1x48x16xf32, #tpu.memory_space<vmem>>, vector<1x48x16xf32>
    %167 = vector.shape_cast %166 : vector<1x48x16xf32> to vector<48x16xf32>
    %168 = vector.shape_cast %165 : vector<48x16xf32> to vector<1x48x16xf32>
    tpu.vector_store %arg11[%c0_140, %c0_141, %c0_142], %168 {strides = array<i32>} : memref<1x48x16xf32, #tpu.memory_space<vmem>>, vector<1x48x16xf32>,
    return
  }
  func.func @transform_0(%arg0: i32) -> (i32, i32, i32) {
    %c0_i32 = arith.constant 0 : i32
    %c0_i32_0 = arith.constant 0 : i32
    %c0_i32_1 = arith.constant 0 : i32
    return %arg0, %c0_i32, %c0_i32_0 : i32, i32, i32
  }
  func.func @transform_1(%arg0: i32) -> (i32, i32, i32) {
    %c0_i32 = arith.constant 0 : i32
    %c0_i32_0 = arith.constant 0 : i32
    %c0_i32_1 = arith.constant 0 : i32
    %c0_i32_2 = arith.constant 0 : i32
    return %c0_i32, %c0_i32_0, %c0_i32_1 : i32, i32, i32
  }
  func.func @transform_2(%arg0: i32) -> (i32, i32, i32) {
    %c0_i32 = arith.constant 0 : i32
    %c0_i32_0 = arith.constant 0 : i32
    %c0_i32_1 = arith.constant 0 : i32
    %c0_i32_2 = arith.constant 0 : i32
    return %c0_i32, %c0_i32_0, %c0_i32_1 : i32, i32, i32
  }
  func.func @transform_3(%arg0: i32) -> (i32, i32) {
    %c0_i32 = arith.constant 0 : i32
    %c0_i32_0 = arith.constant 0 : i32
    %c0_i32_1 = arith.constant 0 : i32
    return %c0_i32, %c0_i32_0 : i32, i32
  }
  func.func @transform_4(%arg0: i32) -> (i32, i32, i32) {
    %c0_i32 = arith.constant 0 : i32
    %c0_i32_0 = arith.constant 0 : i32
    %c0_i32_1 = arith.constant 0 : i32
    %c0_i32_2 = arith.constant 0 : i32
    return %c0_i32, %c0_i32_0, %c0_i32_1 : i32, i32, i32
  }
  func.func @transform_5(%arg0: i32) -> (i32, i32) {
    %c0_i32 = arith.constant 0 : i32
    %c0_i32_0 = arith.constant 0 : i32
    %c0_i32_1 = arith.constant 0 : i32
    return %c0_i32, %c0_i32_0 : i32, i32
  }
  func.func @transform_6(%arg0: i32) -> (i32, i32, i32) {
    %c0_i32 = arith.constant 0 : i32
    %c0_i32_0 = arith.constant 0 : i32
    %c0_i32_1 = arith.constant 0 : i32
    %c0_i32_2 = arith.constant 0 : i32
    return %c0_i32, %c0_i32_0, %c0_i32_1 : i32, i32, i32
  }
  func.func @transform_7(%arg0: i32) -> (i32, i32) {
    %c0_i32 = arith.constant 0 : i32
    %c0_i32_0 = arith.constant 0 : i32
    %c0_i32_1 = arith.constant 0 : i32
    return %c0_i32, %c0_i32_0 : i32, i32
  }
  func.func @transform_8(%arg0: i32) -> (i32, i32, i32) {
    %c0_i32 = arith.constant 0 : i32
    %c0_i32_0 = arith.constant 0 : i32
    %c0_i32_1 = arith.constant 0 : i32
    %c0_i32_2 = arith.constant 0 : i32
    return %c0_i32, %c0_i32_0, %c0_i32_1 : i32, i32, i32
  }
  func.func @transform_9(%arg0: i32) -> (i32, i32) {
    %c0_i32 = arith.constant 0 : i32
    %c0_i32_0 = arith.constant 0 : i32
    %c0_i32_1 = arith.constant 0 : i32
    return %c0_i32, %c0_i32_0 : i32, i32
  }
  func.func @transform_10(%arg0: i32) -> (i32, i32, i32) {
    %c0_i32 = arith.constant 0 : i32
    %c0_i32_0 = arith.constant 0 : i32
    %c0_i32_1 = arith.constant 0 : i32
    return %arg0, %c0_i32, %c0_i32_0 : i32, i32, i32
  }
}

</mosaic_0001>

<bundles_post_ra>
// kernel: slimcae_forward.1
= control target key start
LH: loop header
LB: loop body
LE: loop exit
PB: predicated region body
PF: predicated region fallthrough
CT: control target
= control target key end

     0   :  { %s3366_s13 = smov 0   ;;  %s3843_s0 = inlined_call_operand.vmem [shape: bf16[2,48,16], index: 0, kind: input, shape index: {}]   ;;  %s3844_s1 = inlined_call_operand.vmem [shape: bf16[9,16,16], index: 1, kind: input, shape index: {}]   ;;  %s3845_s2 = inlined_call_operand.vmem [shape: bf16[4,32,48], index: 2, kind: input, shape index: {}]   ;;  %s3846_s3 = inlined_call_operand.vmem [shape: f32[32,1], index: 3, kind: input, shape index: {}]   ;;  %s3847_s4 = inlined_call_operand.vmem [shape: bf16[4,8,32], index: 4, kind: input, shape index: {}]   ;;  %s3848_s5 = inlined_call_operand.vmem [shape: f32[8,1], index: 5, kind: input, shape index: {}]   ;;  %s3849_s6 = inlined_call_operand.vmem [shape: bf16[4,32,8], index: 6, kind: input, shape index: {}]   ;;  %s3850_s7 = inlined_call_operand.vmem [shape: f32[32,1], index: 7, kind: input, shape index: {}]   ;;  %s3851_s8 = inlined_call_operand.vmem [shape: bf16[4,48,32], index: 8, kind: input, shape index: {}]   ;;  %s3852_s9 = inlined_call_operand.vmem [shape: f32[48,1], index: 9, kind: input, shape index: {}]   ;;  %s3853_s10 = inlined_call_operand.vmem [shape: f32[2,48,16], index: 10, kind: output, shape index: {}]  }
   0x1 LB: > { %s2649_s14 = sadd.s32 4294967295, %s3306_s13   ;;  %p2653_p0 = scmp.ge.s32.totalorder %s3306_s13, 1  ;;  %s3306_s13 = sphi %s3366_s13, %s20_s13  }
   0x2   : > { %p312_p1 = scmp.lt.s32.totalorder %s3306_s13, 3 }
   0x4   : > { %p313_p2 = pnand %p2653_p0, %p312_p1 }
   0x5   : > { %p350_p3 = scmp.lt.s32.totalorder (!%p313_p2), %s2649_s14, 1 }
   0x6   : > { %316 = sbr.rel (%p313_p2) target bundleno = 2881 (0xb41), region = 60 }
   0xb   : > { %v3377_v0 = vld [vmem:[%s3844_s1] sm:$0xff]   ;;  %v3308_v1 = vmov 0.0   ;;  %vm3309_vm0 = vmmov 0   ;;  %s3855_s14 = smov (!%p350_p3, %s2649_s14), 1  ;;  %vm390_vm1 = vcmask 130048   ;;  %v3394_v2 = vld [vmem:[%s3844_s1 + $0x8] sm:$0xff]  }
   0xc   : > { %3217 = vmatprep.subr.bf16.mxu1 %v3308_v1  ;;  %2929 = vmatprep.subr.bf16.mxu0 %v3308_v1  ;;  %s3223_s17 = smul.u32 24, %s3855_s14  ;;  %v3243_v6 = vld [vmem:[%s3845_s2 + $0x10] sm:$0xff]   ;;  %vm548_vm2 = vcmask 392192   ;;  %v3244_v7 = vld [vmem:[%s3845_s2] sm:$0xff]   ;;  %v3246_v30 = vld [vmem:[%s3845_s2 + $0x8] sm:$0xff]   ;;  %vm1100_vm3 = vcmask 261120  }
   0xd   : > { %3218 = vmatpush3.bf16.msra.mxu1 %v3377_v0  ;;  %2939 = vmatprep.mubr.msk.bf16.mxu1 %vm3309_vm0, %v3308_v1  ;;  %v3245_v39 = vld [vmem:[%s3845_s2 + $0x18] sm:$0xff]   ;;  %v3248_v41 = vld [vmem:[%s3845_s2 + $0x20] sm:$0xff]   ;;  %vm1503_vm4 = vcmask 64512   ;;  %vm1510_vm5 = vcmask 1043456   ;;  %s3224_s19 = smul.u32 48, %s3855_s14 }
   0xe   : > { %2943 = vmatprep.subr.bf16.mxu1 %v3308_v1  ;;  %2930 = vmatpush3.bf16.msra.mxu0 %v3377_v0  ;;  %s354_s22 = scalar_lea.vmem %s3843_s0, %s3223_s17  ;;  %v3444_v40 = vld [vmem:[%s3844_s1 + $0x18] sm:$0xff]  }
   0xf   : > { %2931 = vmatprep.mubr.msk.bf16.mxu0 %vm3309_vm0, %v3308_v1  ;;  %v3399_v3 = vld [vmem:[%s354_s22 + $0x10] sm:$0xff]   ;;  %v3403_v4 = vld [vmem:[%s354_s22] sm:$0xff]   ;;  %v3412_v5 = vld [vmem:[%s354_s22 + $0x8] sm:$0xff]   ;;  %s359_s22 = scalar_lea.vmem %s3853_s10, %s3224_s19 }
  0x10   : > { %2940 = vmatmul.mubr.msk.bf16.vlgmr.msra.gmra.mxu1 %vm390_vm1, %v3399_v3 }
  0x11   : > { %2944 = vmatpush3.bf16.msra.mxu1 %v3394_v2  ;;  %2945 = vmatprep.mubr.msk.bf16.mxu1 %vm3309_vm0, %v3308_v1 }
  0x12   : > { %2932 = vmatmul.mubr.msk.bf16.vlgmr.msra.gmra.mxu0 %vm390_vm1, %v3403_v4 }
  0x13   : > { %2935 = vmatprep.mubr.msk.bf16.mxu0 %vm3309_vm0, %v3308_v1 }
  0x18   : > { %2946 = vmatmul.mubr.msk.bf16.vlgmr.msra.gmra.mxu1 %vm390_vm1, %v3403_v4 }
  0x19   : > { %2949 = vmatprep.mubr.msk.bf16.mxu1 %vm3309_vm0, %v3308_v1 }
  0x1a   : > { %2936 = vmatmul.mubr.msk.bf16.gmra.mxu0 %vm390_vm1, %v3412_v5 }
  0x1b   : > { %2963 = vmatprep.mubr.msk.bf16.mxu0 %vm548_vm2, %v3243_v6 }
  0x20   : > { %2950 = vmatmul.mubr.msk.bf16.gmra.mxu1 %vm390_vm1, %v3412_v5 }
  0x21   : > { %2953 = vmatprep.mubr.msk.bf16.mxu1 %vm3309_vm0, %v3308_v1 }
  0x28   : > { %2954 = vmatmul.mubr.msk.bf16.gmra.mxu1 %vm390_vm1, %v3399_v3 }
  0x29   : > { %2973 = vmatprep.mubr.msk.bf16.mxu1 %vm548_vm2, %v3244_v7 }
  0xd0   : > { %v450_v8 = vpop.f32.mrf.mxu1 }
  0xd2   : > { %v2941_v9 = vpop.f32.mrf.mxu1  ;;  %v434_v10 = vpop.f32.mrf.mxu0 }
  0xd3   : > { %v3249_v9 = vld [vmem:[%s3845_s2 + $0x28] sm:$0xff]  }
  0xd4   : > { %v453_v11 = vpop.f32.mrf.mxu1  ;;  %v2933_v12 = vpop.f32.mrf.mxu0 }
  0xd5   : > { %v459_v13 = vpack.c.bf16 %v453_v11, %v450_v8  ;;  %v3310_v11 = vmov 0   ;;  %v958_v12 = vld [vmem:[%s3846_s3 + $0x18] sm:$0xff] }
  0xd6   : > { %v2942_v14 = vpop.f32.mrf.mxu1  ;;  %v437_v15 = vpop.f32.mrf.mxu0  ;;  %3236 = vset.pattern.permute.xlu0 %v3310_v11  ;;  %3237 = vset.pattern.permute.xlu1 %v3310_v11 }
  0xd7   : > { %2967 = vmatprep.subr.bf16.mxu1 %v459_v13  ;;  %v457_v24 = vpack.c.bf16 %v437_v15, %v434_v10  ;;  %v3479_v10 = vld [vmem:[%s3844_s1 + $0x20] sm:$0xff]   ;;  %v1886_v15 = vld [vmem:[%s3850_s7 + $0x8] sm:$0xff] }
  0xd8   : > { %v507_v16 = vpop.f32.mrf.mxu1  ;;  %2968 = vmatpush3.bf16.msra.mxu1 %v459_v13  ;;  %v2934_v17 = vpop.f32.mrf.mxu0  ;;  %v1381_v13 = vld [vmem:[%s3848_s5] sm:$0xff] }
  0xd9   : > { %v1885_v14 = vld [vmem:[%s3850_s7] sm:$0xff]  ;;  %v1888_v17 = vld [vmem:[%s3850_s7 + $0x18] sm:$0xff] }
  0xda   : > { %v2947_v18 = vpop.f32.mrf.mxu1  ;;  %v442_v19 = vpop.f32.mrf.mxu0 }
  0xdb   : > { %v2492_v18 = vld [vmem:[%s3852_s9] sm:$0xff] }
  0xdc   : > { %v510_v20 = vpop.f32.mrf.mxu1  ;;  %v2937_v21 = vpop.f32.mrf.mxu0 }
  0xdd   : > { %v530_v38 = vpack.c.bf16 %v510_v20, %v507_v16  ;;  %v1887_v16 = vld [vmem:[%s3850_s7 + $0x10] sm:$0xff]  ;;  %v2495_v21 = vld [vmem:[%s3852_s9 + $0x18] sm:$0xff] }
  0xde   : > { %v2948_v22 = vpop.f32.mrf.mxu1  ;;  %v445_v23 = vpop.f32.mrf.mxu0  ;;  %v2494_v20 = vld [vmem:[%s3852_s9 + $0x10] sm:$0xff] }
  0xdf   : > { %v458_v25 = vpack.c.bf16 %v445_v23, %v442_v19  ;;  %v2493_v19 = vld [vmem:[%s3852_s9 + $0x8] sm:$0xff]  ;;  %v2496_v22 = vld [vmem:[%s3852_s9 + $0x20] sm:$0xff] }
  0xe0   : > { %v515_v26 = vpop.f32.mrf.mxu1  ;;  %v2938_v27 = vpop.f32.mrf.mxu0  ;;  %v2497_v23 = vld [vmem:[%s3852_s9 + $0x28] sm:$0xff] }
  0xe1   : > { %2969 = vmatprep.subr.bf16.mxu1 %v458_v25 }
  0xe2   : > { %v2951_v28 = vpop.f32.mrf.mxu1  ;;  %2970 = vmatpush3.bf16.msra.mxu1 %v458_v25 }
  0xe3   : > { %2971 = vmatprep.subr.bf16.mxu1 %v457_v24 }
  0xe4   : > { %v518_v29 = vpop.f32.mrf.mxu1 }
  0xe5   : > { %v531_v37 = vpack.c.bf16 %v518_v29, %v515_v26 }
  0xe6   : > { %v2952_v31 = vpop.f32.mrf.mxu1  ;;  %2972 = vmatpush3.bf16.msra.mxu1 %v457_v24 }
  0xe8   : > { %v523_v32 = vpop.f32.mrf.mxu1 }
  0xe9   : > { %2974 = vmatmul.mubr.msk.bf16.vlgmr.msra.gmra.mxu1 %vm548_vm2, %v3246_v30 }
  0xea   : > { %v2955_v33 = vpop.f32.mrf.mxu1  ;;  %2997 = vmatprep.mubr.msk.bf16.mxu1 %vm548_vm2, %v3248_v41 }
  0xec   : > { %v526_v34 = vpop.f32.mrf.mxu1 }
  0xed   : > { %v532_v35 = vpack.c.bf16 %v526_v34, %v523_v32 }
  0xee   : > { %v2956_v36 = vpop.f32.mrf.mxu1 }
  0xef   : > { %2957 = vmatprep.subr.bf16.mxu0 %v532_v35 }
  0xf0   : > { %2958 = vmatpush3.bf16.msra.mxu0 %v532_v35 }
  0xf1   : > { %2959 = vmatprep.subr.bf16.mxu0 %v531_v37 }
  0xf4   : > { %2960 = vmatpush3.bf16.msra.mxu0 %v531_v37 }
  0xf5   : > { %2961 = vmatprep.subr.bf16.mxu0 %v530_v38 }
  0xf8   : > { %2962 = vmatpush3.bf16.msra.mxu0 %v530_v38 }
  0xf9   : > { %2977 = vmatprep.subr.bf16.mxu0 %v3308_v1 }
  0xfb   : > { %2964 = vmatmul.mubr.msk.bf16.vlgmr.msra.gmra.mxu0 %vm548_vm2, %v3245_v39 }
  0xfc   : > { %2978 = vmatpush3.bf16.msra.mxu0 %v3444_v40  ;;  %2979 = vmatprep.mubr.msk.bf16.mxu0 %vm3309_vm0, %v3308_v1 }
 0x103   : > { %2980 = vmatmul.mubr.msk.bf16.vlgmr.msra.gmra.mxu0 %vm390_vm1, %v3403_v4 }
 0x104   : > { %2983 = vmatprep.mubr.msk.bf16.mxu0 %vm3309_vm0, %v3308_v1 }
 0x10b   : > { %2984 = vmatmul.mubr.msk.bf16.gmra.mxu0 %vm390_vm1, %v3412_v5 }
 0x10c   : > { %2987 = vmatprep.mubr.msk.bf16.mxu0 %vm3309_vm0, %v3308_v1 }
 0x113   : > { %2988 = vmatmul.mubr.msk.bf16.gmra.mxu0 %vm390_vm1, %v3399_v3 }
 0x1a9   : > { %v2975_v42 = vpop.f32.mrf.mxu1 }
 0x1ab   : > { %v654_v43 = vpop.f32.mrf.mxu1 }
 0x1ad   : > { %v2976_v47 = vpop.f32.mrf.mxu1 }
 0x1af   : > { %v657_v24 = vpop.f32.mrf.mxu1 }
 0x1bb   : > { %v2965_v44 = vpop.f32.mrf.mxu0 }
 0x1bc   : > { %v3465_v45 = vadd.f32 %v2975_v42, %v2965_v44 }
 0x1bd   : > { %v589_v46 = vpop.f32.mrf.mxu0 }
 0x1be   : > { %v3467_v48 = vadd.f32 %v654_v43, %v589_v46 }
 0x1bf   : > { %v2966_v49 = vpop.f32.mrf.mxu0 }
 0x1c0   : > { %v3469_v50 = vadd.f32 %v2976_v47, %v2966_v49 }
 0x1c1   : > { %v3471_v51 = vpop.f32.mrf.mxu0 }
 0x1c2   : > { %v658_v30 = vadd.f32 %v657_v24, %v3471_v51  ;;  %v1046_v24 = vld [vmem:[%s3847_s4] sm:$0xf] }
 0x1c3   : > { %v712_v52 = vpop.f32.mrf.mxu0 }
 0x1c5   : > { %v2981_v53 = vpop.f32.mrf.mxu0 }
 0x1c7   : > { %v715_v54 = vpop.f32.mrf.mxu0 }
 0x1c8   : > { %v735_v8 = vpack.c.bf16 %v715_v54, %v712_v52 }
 0x1c9   : > { %v2982_v55 = vpop.f32.mrf.mxu0 }
 0x1cb   : > { %v720_v56 = vpop.f32.mrf.mxu0 }
 0x1cd   : > { %v2985_v57 = vpop.f32.mrf.mxu0 }
 0x1cf   : > { %v723_v58 = vpop.f32.mrf.mxu0 }
 0x1d0   : > { %v736_v7 = vpack.c.bf16 %v723_v58, %v720_v56 }
 0x1d1   : > { %v2986_v59 = vpop.f32.mrf.mxu0 }
 0x1d3   : > { %v728_v60 = vpop.f32.mrf.mxu0 }
 0x1d5   : > { %v2989_v61 = vpop.f32.mrf.mxu0 }
 0x1d7   : > { %v731_v62 = vpop.f32.mrf.mxu0 }
 0x1d8   : > { %v737_v63 = vpack.c.bf16 %v731_v62, %v728_v60 }
 0x1d9   : > { %v2990_v6 = vpop.f32.mrf.mxu0 }
 0x1da   : > { %2991 = vmatprep.subr.bf16.mxu1 %v737_v63 }
 0x1db   : > { %2992 = vmatpush3.bf16.msra.mxu1 %v737_v63 }
 0x1dc   : > { %2993 = vmatprep.subr.bf16.mxu1 %v736_v7 }
 0x1df   : > { %2994 = vmatpush3.bf16.msra.mxu1 %v736_v7 }
 0x1e0   : > { %2995 = vmatprep.subr.bf16.mxu1 %v735_v8 }
 0x1e3   : > { %2996 = vmatpush3.bf16.msra.mxu1 %v735_v8 }
 0x1e4   : > { %3001 = vmatprep.subr.bf16.mxu1 %v3308_v1 }
 0x1e6   : > { %2998 = vmatmul.mubr.msk.bf16.vlgmr.msra.gmra.mxu1 %vm548_vm2, %v3249_v9 }
 0x1e7   : > { %3002 = vmatpush3.bf16.msra.mxu1 %v3479_v10  ;;  %3003 = vmatprep.mubr.msk.bf16.mxu1 %vm3309_vm0, %v3308_v1 }
 0x1e8   : > { %3031 = vmatprep.subr.bf16.mxu1 %v3394_v2 }
 0x1ee   : > { %3004 = vmatmul.mubr.msk.bf16.vlgmr.msra.gmra.mxu1 %vm390_vm1, %v3403_v4  ;;  %v3251_v4 = vld [vmem:[%s3845_s2 + $0x30] sm:$0xff]  }
 0x1ef   : > { %3007 = vmatprep.mubr.msk.bf16.mxu1 %vm3309_vm0, %v3308_v1  ;;  %3032 = vmatpush3.bf16.msra.mxu1 %v3394_v2  ;;  %v955_v2 = vld [vmem:[%s3846_s3] sm:$0xff] }
 0x1f0   : > { %3045 = vmatprep.subr.bf16.mxu1 %v3308_v1  ;;  %3021 = vmatprep.mubr.msk.bf16.mxu0 %vm548_vm2, %v3251_v4 }
 0x1f1   : > { %961 = vperm.xlu0 %3236, %v955_v2  }
 0x1f6   : > { %3008 = vmatmul.mubr.msk.bf16.gmra.mxu1 %vm390_vm1, %v3412_v5  ;;  %v957_v5 = vld [vmem:[%s3846_s3 + $0x10] sm:$0xff] }
 0x1f7   : > { %3011 = vmatprep.mubr.msk.bf16.mxu1 %vm3309_vm0, %v3308_v1  ;;  %971 = vperm.xlu1 %3237, %v957_v5  }
 0x1fb   : > { %976 = vperm.xlu1 %3237, %v958_v12  }
 0x1fe   : > { %3012 = vmatmul.mubr.msk.bf16.gmra.mxu1 %vm390_vm1, %v3399_v3  ;;  %v956_v3 = vld [vmem:[%s3846_s3 + $0x8] sm:$0xff] }
 0x1ff   : > { %966 = vperm.xlu0 %3236, %v956_v3   ;;  %1891 = vperm.xlu1 %3237, %v1885_v14  }
 0x203   : > { %1384 = vperm.xlu0 %3236, %v1381_v13   ;;  %1901 = vperm.xlu1 %3237, %v1887_v16  }
 0x207   : > { %1896 = vperm.xlu0 %3236, %v1886_v15   ;;  %2500 = vperm.xlu1 %3237, %v2492_v18  }
 0x20b   : > { %1906 = vperm.xlu0 %3236, %v1888_v17   ;;  %2510 = vperm.xlu1 %3237, %v2494_v20  }
 0x20f   : > { %2505 = vperm.xlu0 %3236, %v2493_v19   ;;  %2520 = vperm.xlu1 %3237, %v2496_v22  }
 0x213   : > { %2515 = vperm.xlu0 %3236, %v2495_v21  }
 0x217   : > { %2525 = vperm.xlu0 %3236, %v2497_v23   ;;  %v2713_v23 = vld [vmem:[%s3847_s4 + $0x4] sm:$0xf] }
 0x26c   : > { %v962_v54 = vpop.permute.xlu0 %961 }
 0x272   : > { %v972_v51 = vpop.permute.xlu1 %971 }
 0x276   : > { %v977_v60 = vpop.permute.xlu1 %976 }
 0x27a   : > { %v967_v7 = vpop.permute.xlu0 %966 }
 0x2a6   : > { %v2999_v25 = vpop.f32.mrf.mxu1 }
 0x2a7   : > { %v810_v26 = vadd.f32 %v2999_v25, %v3465_v45 }
 0x2a8   : > { %v793_v27 = vpop.f32.mrf.mxu1 }
 0x2a9   : > { %v808_v28 = vadd.f32 %v793_v27, %v3467_v48 }
 0x2aa   : > { %v3000_v29 = vpop.f32.mrf.mxu1 }
 0x2ab   : > { %v811_v31 = vadd.f32 %v3000_v29, %v3469_v50  ;;  %v3252_v50 = vld [vmem:[%s3845_s2 + $0x38] sm:$0xff]  }
 0x2ac   : > { %v796_v32 = vpop.f32.mrf.mxu1 }
 0x2ad   : > { %v809_v33 = vadd.f32 %v796_v32, %v658_v30 }
 0x2ae   : > { %v855_v34 = vpop.f32.mrf.mxu1 }
 0x2b0   : > { %v3005_v35 = vpop.f32.mrf.mxu1 }
 0x2b2   : > { %v858_v36 = vpop.f32.mrf.mxu1 }
 0x2b3   : > { %v878_v49 = vpack.c.bf16 %v858_v36, %v855_v34 }
 0x2b4   : > { %v3006_v37 = vpop.f32.mrf.mxu1 }
 0x2b6   : > { %v863_v38 = vpop.f32.mrf.mxu1 }
 0x2b8   : > { %v3009_v39 = vpop.f32.mrf.mxu1 }
 0x2ba   : > { %v866_v41 = vpop.f32.mrf.mxu1 }
 0x2bb   : > { %v879_v48 = vpack.c.bf16 %v866_v41, %v863_v38 }
 0x2bc   : > { %v3010_v42 = vpop.f32.mrf.mxu1 }
 0x2bd   : > { %v2718_v42 = vld [vmem:[%s3847_s4 + $0x8] sm:$0xf] }
 0x2be   : > { %v871_v43 = vpop.f32.mrf.mxu1 }
 0x2c0   : > { %v3013_v44 = vpop.f32.mrf.mxu1 }
 0x2c2   : > { %v874_v45 = vpop.f32.mrf.mxu1 }
 0x2c3   : > { %v880_v46 = vpack.c.bf16 %v874_v45, %v871_v43 }
 0x2c4   : > { %v3014_v47 = vpop.f32.mrf.mxu1 }
 0x2c5   : > { %3015 = vmatprep.subr.bf16.mxu0 %v880_v46  ;;  %v2722_v47 = vld [vmem:[%s3847_s4 + $0xc] sm:$0xf] }
 0x2c6   : > { %3016 = vmatpush3.bf16.msra.mxu0 %v880_v46 }
 0x2c7   : > { %3017 = vmatprep.subr.bf16.mxu0 %v879_v48 }
 0x2ca   : > { %3018 = vmatpush3.bf16.msra.mxu0 %v879_v48  ;;  %v3611_v48 = vld [vmem:[%s3844_s1 + $0x28] sm:$0xff]  }
 0x2cb   : > { %3019 = vmatprep.subr.bf16.mxu0 %v878_v49 }
 0x2ce   : > { %3020 = vmatpush3.bf16.msra.mxu0 %v878_v49 }
 0x2cf   : > { %3025 = vmatprep.subr.bf16.mxu0 %v3377_v0 }
 0x2d1   : > { %3022 = vmatmul.mubr.msk.bf16.vlgmr.msra.gmra.mxu0 %vm548_vm2, %v3252_v50 }
 0x2d2   : > { %3026 = vmatpush3.bf16.msra.mxu0 %v3377_v0 }
 0x2d3   : > { %3037 = vmatprep.subr.bf16.mxu0 %v3308_v1 }
 0x391   : > { %v3023_v52 = vpop.f32.mrf.mxu0 }
 0x392   : > { %v953_v53 = vadd.f32 %v3023_v52, %v810_v26 }
 0x393   : > { %v936_v55 = vpop.f32.mrf.mxu0 }
 0x394   : > { %v951_v56 = vadd.f32 %v936_v55, %v808_v28  ;;  %v981_v58 = vadd.f32 %v972_v51, %v953_v53 }
 0x395   : > { %v3024_v57 = vpop.f32.mrf.mxu0 }
 0x396   : > { %v954_v59 = vadd.f32 %v3024_v57, %v811_v31  ;;  %v979_v62 = vadd.f32 %v962_v54, %v951_v56  ;;  %v985_v8 = vmax.f32 %v981_v58, 0.0  ;;  %v1385_v56 = vpop.permute.xlu0 %1384 }
 0x397   : > { %v939_v61 = vpop.f32.mrf.mxu0 }
 0x398   : > { %v982_v63 = vadd.f32 %v977_v60, %v954_v59  ;;  %v952_v6 = vadd.f32 %v939_v61, %v809_v33  ;;  %v983_v4 = vmax.f32 %v979_v62, 0.0 }
 0x39a   : > { %v986_v9 = vmax.f32 %v982_v63, 0.0  ;;  %v980_v0 = vadd.f32 %v967_v7, %v952_v6  ;;  %v3254_v63 = vld [vmem:[%s3849_s6 + $0x10] sm:$0xff]   ;;  %v3255_v6 = vld [vmem:[%s3849_s6] sm:$0xff]  }
 0x39c   : > { %v988_v2 = vpack.c.bf16 %v986_v9, %v985_v8  ;;  %v984_v5 = vmax.f32 %v980_v0, 0.0 }
 0x39e   : > { %v987_v11 = vpack.c.bf16 %v984_v5, %v983_v4 }
 0x3a0   : > { %3027 = vmatprep.mubr.msk.bf16.mxu0 %vm390_vm1, %v987_v11  ;;  %3033 = vmatprep.mubr.msk.bf16.mxu1 %vm390_vm1, %v987_v11 }
 0x3a1   : > { %3028 = vmatmul.mubr.msk.bf16.vlgmr.msra.gmra.mxu0 %vm390_vm1, %v988_v2  ;;  %3034 = vmatmul.mubr.msk.bf16.vlgmr.msra.gmra.mxu1 %vm390_vm1, %v988_v2 }
 0x3a2   : > { %3041 = vmatprep.mubr.msk.bf16.mxu0 %vm3309_vm0, %v3308_v1  ;;  %3049 = vmatprep.mubr.msk.bf16.mxu1 %vm3309_vm0, %v3308_v1 }
 0x461   : > { %v3029_v3 = vpop.f32.mrf.mxu0  ;;  %v3035_v12 = vpop.f32.mrf.mxu1 }
 0x463   : > { %v1029_v13 = vpop.f32.mrf.mxu0  ;;  %v1081_v14 = vpop.f32.mrf.mxu1 }
 0x465   : > { %v3030_v15 = vpop.f32.mrf.mxu0  ;;  %v3036_v16 = vpop.f32.mrf.mxu1 }
 0x466   : > { %v1045_v17 = vpack.c.bf16 %v3030_v15, %v3029_v3  ;;  %v1097_v18 = vpack.c.bf16 %v3036_v16, %v3035_v12  ;;  %v3256_v3 = vld [vmem:[%s3849_s6 + $0x18] sm:$0xff]   ;;  %v3257_v12 = vld [vmem:[%s3849_s6 + $0x8] sm:$0xff]  }
 0x467   : > { %v1032_v19 = vpop.f32.mrf.mxu0  ;;  %v1084_v20 = vpop.f32.mrf.mxu1  ;;  %v3637_v15 = vld [vmem:[%s3844_s1 + $0x38] sm:$0xff]  }
 0x468   : > { %3038 = vmatpush3.bf16.msra.mxu0 %v1097_v18  ;;  %3046 = vmatpush3.bf16.msra.mxu1 %v1045_v17  ;;  %v1044_v21 = vpack.c.bf16 %v1032_v19, %v1029_v13  ;;  %v1096_v22 = vpack.c.bf16 %v1084_v20, %v1081_v14  ;;  %v3649_v18 = vld [vmem:[%s3844_s1 + $0x40] sm:$0xff]  }
 0x469   : > { %3039 = vmatprep.subr.bf16.mxu0 %v3308_v1  ;;  %3047 = vmatprep.subr.bf16.mxu1 %v3308_v1  ;;  %v3260_v19 = vld [vmem:[%s3849_s6 + $0x20] sm:$0xff]  }
 0x46c   : > { %3040 = vmatpush3.bf16.msra.mxu0 %v1096_v22  ;;  %3048 = vmatpush3.bf16.msra.mxu1 %v1044_v21 }
 0x46d   : > { %3053 = vmatprep.subr.bf16.mxu0 %v3444_v40  ;;  %3059 = vmatprep.subr.bf16.mxu1 %v3308_v1 }
 0x46f   : > { %3042 = vmatmul.mubr.msk.bf16.vlgmr.msra.gmra.mxu0 %vm1100_vm3, %v2713_v23  ;;  %3050 = vmatmul.mubr.msk.bf16.vlgmr.msra.gmra.mxu1 %vm1100_vm3, %v1046_v24 }
 0x470   : > { %3055 = vmatprep.mubr.msk.bf16.mxu0 %vm390_vm1, %v987_v11  ;;  %3054 = vmatpush3.bf16.msra.mxu0 %v3444_v40 }
 0x471   : > { %3067 = vmatprep.subr.bf16.mxu0 %v3479_v10  ;;  %3063 = vmatprep.mubr.msk.bf16.mxu1 %vm3309_vm0, %v3308_v1 }
 0x477   : > { %3056 = vmatmul.mubr.msk.bf16.vlgmr.msra.gmra.mxu0 %vm390_vm1, %v988_v2 }
 0x478   : > { %3069 = vmatprep.mubr.msk.bf16.mxu0 %vm390_vm1, %v987_v11  ;;  %3068 = vmatpush3.bf16.msra.mxu0 %v3479_v10 }
 0x479   : > { %3081 = vmatprep.subr.bf16.mxu0 %v3308_v1 }
 0x47f   : > { %3070 = vmatmul.mubr.msk.bf16.vlgmr.msra.gmra.mxu0 %vm390_vm1, %v988_v2 }
 0x480   : > { %3082 = vmatpush3.bf16.msra.mxu0 %v3479_v10  ;;  %3083 = vmatprep.mubr.msk.bf16.mxu0 %vm3309_vm0, %v3308_v1 }
 0x52f   : > { %v1138_v40 = vpop.f32.mrf.mxu0  ;;  %v1181_v25 = vpop.f32.mrf.mxu1 }
 0x530   : > { %v1182_v26 = vadd.f32 %v1181_v25, %v1138_v40 }
 0x531   : > { %v3043_v27 = vpop.f32.mrf.mxu0  ;;  %v3051_v28 = vpop.f32.mrf.mxu1 }
 0x532   : > { %v3262_v28 = vld [vmem:[%s3849_s6 + $0x30] sm:$0xff]  }
 0x533   : > { %v1141_v29 = vpop.f32.mrf.mxu0  ;;  %v1184_v30 = vpop.f32.mrf.mxu1 }
 0x535   : > { %v3044_v31 = vpop.f32.mrf.mxu0  ;;  %v3052_v32 = vpop.f32.mrf.mxu1 }
 0x537   : > { %v3057_v33 = vpop.f32.mrf.mxu0 }
 0x539   : > { %v1221_v34 = vpop.f32.mrf.mxu0 }
 0x53b   : > { %v3058_v35 = vpop.f32.mrf.mxu0 }
 0x53c   : > { %v1237_v36 = vpack.c.bf16 %v3058_v35, %v3057_v33 }
 0x53d   : > { %v1224_v37 = vpop.f32.mrf.mxu0 }
 0x53e   : > { %3060 = vmatpush3.bf16.msra.mxu1 %v1237_v36  ;;  %v1236_v39 = vpack.c.bf16 %v1224_v37, %v1221_v34  ;;  %v3263_v34 = vld [vmem:[%s3849_s6 + $0x38] sm:$0xff]  }
 0x53f   : > { %v3071_v38 = vpop.f32.mrf.mxu0  ;;  %3061 = vmatprep.subr.bf16.mxu1 %v3308_v1 }
 0x541   : > { %v1318_v41 = vpop.f32.mrf.mxu0 }
 0x542   : > { %3062 = vmatpush3.bf16.msra.mxu1 %v1236_v39 }
 0x543   : > { %v3072_v43 = vpop.f32.mrf.mxu0  ;;  %3073 = vmatprep.subr.bf16.mxu1 %v3308_v1 }
 0x544   : > { %v1334_v44 = vpack.c.bf16 %v3072_v43, %v3071_v38 }
 0x545   : > { %3064 = vmatmul.mubr.msk.bf16.vlgmr.msra.gmra.mxu1 %vm1100_vm3, %v2718_v42  ;;  %v1321_v45 = vpop.f32.mrf.mxu0 }
 0x546   : > { %3074 = vmatpush3.bf16.msra.mxu1 %v1334_v44  ;;  %3077 = vmatprep.mubr.msk.bf16.mxu1 %vm3309_vm0, %v3308_v1  ;;  %v1333_v46 = vpack.c.bf16 %v1321_v45, %v1318_v41 }
 0x547   : > { %3075 = vmatprep.subr.bf16.mxu1 %v3308_v1 }
 0x54a   : > { %3076 = vmatpush3.bf16.msra.mxu1 %v1333_v46  ;;  %v1892_v46 = vpop.permute.xlu1 %1891 }
 0x54b   : > { %3087 = vmatprep.subr.bf16.mxu1 %v3308_v1 }
 0x54d   : > { %3078 = vmatmul.mubr.msk.bf16.vlgmr.msra.gmra.mxu1 %vm1100_vm3, %v2722_v47 }
 0x54e   : > { %3089 = vmatprep.mubr.msk.bf16.mxu1 %vm3309_vm0, %v3308_v1  ;;  %3088 = vmatpush3.bf16.msra.mxu1 %v3611_v48 }
 0x605   : > { %v1277_v49 = vpop.f32.mrf.mxu1 }
 0x606   : > { %v1283_v53 = vadd.f32 %v1277_v49, %v1182_v26 }
 0x607   : > { %v3065_v50 = vpop.f32.mrf.mxu1 }
 0x609   : > { %v1280_v51 = vpop.f32.mrf.mxu1 }
 0x60a   : > { %v1897_v51 = vpop.permute.xlu0 %1896 }
 0x60b   : > { %v3066_v52 = vpop.f32.mrf.mxu1 }
 0x60d   : > { %v1374_v54 = vpop.f32.mrf.mxu1 }
 0x60e   : > { %v1380_v55 = vadd.f32 %v1374_v54, %v1283_v53 }
 0x60f   : > { %v3079_v57 = vpop.f32.mrf.mxu1 }
 0x610   : > { %v1387_v58 = vadd.f32 %v1385_v56, %v1380_v55 }
 0x611   : > { %v1377_v59 = vpop.f32.mrf.mxu1 }
 0x612   : > { %v1388_v60 = vmax.f32 %v1387_v58, 0.0  ;;  %v1902_v59 = vpop.permute.xlu1 %1901 }
 0x613   : > { %v3080_v61 = vpop.f32.mrf.mxu1 }
 0x614   : > { %v1389_v62 = vpack.c.bf16 %v1388_v60, %v1388_v60 }
 0x616   : > { %3084 = vmatmul.mubr.msk.bf16.vlgmr.msra.gmra.mxu0 %vm390_vm1, %v1389_v62  ;;  %3090 = vmatmul.mubr.msk.bf16.vlgmr.msra.gmra.mxu1 %vm390_vm1, %v1389_v62 }
 0x617   : > { %3095 = vmatprep.mubr.msk.bf16.mxu0 %vm1503_vm4, %v3254_v63  ;;  %3101 = vmatprep.mubr.msk.bf16.mxu1 %vm1503_vm4, %v3255_v6  ;;  %v1907_v6 = vpop.permute.xlu0 %1906 }
 0x6d6   : > { %v1427_v7 = vpop.f32.mrf.mxu0  ;;  %v1481_v8 = vpop.f32.mrf.mxu1 }
 0x6d7   : > { %v1433_v9 = vpack.c.bf16 %v1427_v7, %v1427_v7  ;;  %v1487_v0 = vpack.c.bf16 %v1481_v8, %v1481_v8 }
 0x6d8   : > { %v3085_v4 = vpop.f32.mrf.mxu0  ;;  %v3091_v2 = vpop.f32.mrf.mxu1 }
 0x6d9   : > { %v1580_v5 = vsel %vm1510_vm5, %v1433_v9, 0  ;;  %v1512_v11 = vsel %vm1510_vm5, %v1487_v0, 0  ;;  %3219 = vmatprep.subr.msk.bf16.mxu0 %vm1510_vm5, %v1487_v0  ;;  %3220 = vmatprep.subr.msk.bf16.mxu1 %vm1510_vm5, %v1433_v9 }
 0x6da   : > { %v1430_v13 = vpop.f32.mrf.mxu0  ;;  %v1484_v14 = vpop.f32.mrf.mxu1  ;;  %3094 = vmatpush3.bf16.msra.mxu0 %v1512_v11  ;;  %3100 = vmatpush3.bf16.msra.mxu1 %v1580_v5 }
 0x6db   : > { %3105 = vmatprep.subr.bf16.mxu0 %v3308_v1 }
 0x6dc   : > { %v3086_v16 = vpop.f32.mrf.mxu0  ;;  %v3092_v17 = vpop.f32.mrf.mxu1 }
 0x6dd   : > { %3096 = vmatmul.mubr.msk.bf16.vlgmr.msra.gmra.mxu0 %vm1503_vm4, %v3256_v3  ;;  %3102 = vmatmul.mubr.msk.bf16.vlgmr.msra.gmra.mxu1 %vm1503_vm4, %v3257_v12 }
 0x6de   : > { %3106 = vmatpush3.bf16.msra.mxu0 %v3637_v15  ;;  %3107 = vmatprep.mubr.msk.bf16.mxu0 %vm3309_vm0, %v3308_v1 }
 0x6df   : > { %3117 = vmatprep.subr.bf16.mxu0 %v3308_v1  ;;  %3113 = vmatprep.mubr.msk.bf16.mxu1 %vm1503_vm4, %v3260_v19 }
 0x6e5   : > { %3108 = vmatmul.mubr.msk.bf16.vlgmr.msra.gmra.mxu0 %vm390_vm1, %v1389_v62 }
 0x6e6   : > { %3118 = vmatpush3.bf16.msra.mxu0 %v3649_v18  ;;  %3119 = vmatprep.mubr.msk.bf16.mxu0 %vm3309_vm0, %v3308_v1 }
 0x6e7   : > { %3129 = vmatprep.subr.bf16.mxu0 %v3479_v10 }
 0x6ed   : > { %3120 = vmatmul.mubr.msk.bf16.vlgmr.msra.gmra.mxu0 %vm390_vm1, %v1389_v62 }
 0x6ee   : > { %3130 = vmatpush3.bf16.msra.mxu0 %v3479_v10  ;;  %v3261_v10 = vld [vmem:[%s3849_s6 + $0x28] sm:$0xff]  }
 0x6ef   : > { %3141 = vmatprep.subr.bf16.mxu0 %v3308_v1 }
 0x79d   : > { %v3097_v20 = vpop.f32.mrf.mxu0  ;;  %v3103_v37 = vpop.f32.mrf.mxu1 }
 0x79e   : > { %v1625_v45 = vadd.f32 %v3103_v37, %v3097_v20 }
 0x79f   : > { %v1548_v21 = vpop.f32.mrf.mxu0  ;;  %v1616_v38 = vpop.f32.mrf.mxu1 }
 0x7a0   : > { %v1617_v49 = vadd.f32 %v1616_v38, %v1548_v21 }
 0x7a1   : > { %v3098_v22 = vpop.f32.mrf.mxu0  ;;  %v3104_v39 = vpop.f32.mrf.mxu1 }
 0x7a2   : > { %v1628_v53 = vadd.f32 %v3104_v39, %v3098_v22 }
 0x7a3   : > { %v1551_v23 = vpop.f32.mrf.mxu0  ;;  %v1619_v41 = vpop.f32.mrf.mxu1 }
 0x7a4   : > { %v1620_v56 = vadd.f32 %v1619_v41, %v1551_v23 }
 0x7a5   : > { %v1674_v24 = vpop.f32.mrf.mxu0 }
 0x7a6   : > { %v1680_v40 = vpack.c.bf16 %v1674_v24, %v1674_v24 }
 0x7a7   : > { %v3109_v25 = vpop.f32.mrf.mxu0 }
 0x7a8   : > { %v1703_v26 = vsel %vm1510_vm5, %v1680_v40, 0  ;;  %3221 = vmatprep.subr.msk.bf16.mxu1 %vm1510_vm5, %v1680_v40 }
 0x7a9   : > { %v1677_v27 = vpop.f32.mrf.mxu0  ;;  %3112 = vmatpush3.bf16.msra.mxu1 %v1703_v26 }
 0x7aa   : > { %v3265_v27 = vld [vmem:[%s3851_s8] sm:$0xff]  }
 0x7ab   : > { %v3110_v29 = vpop.f32.mrf.mxu0 }
 0x7ac   : > { %3114 = vmatmul.mubr.msk.bf16.vlgmr.msra.gmra.mxu1 %vm1503_vm4, %v3261_v10  ;;  %v3264_v10 = vld [vmem:[%s3851_s8 + $0x18] sm:$0xff]   ;;  %v3267_v29 = vld [vmem:[%s3851_s8 + $0x8] sm:$0xff]  }
 0x7ad   : > { %v1801_v30 = vpop.f32.mrf.mxu0  ;;  %3125 = vmatprep.mubr.msk.bf16.mxu1 %vm1503_vm4, %v3262_v28  ;;  %v3266_v28 = vld [vmem:[%s3851_s8 + $0x20] sm:$0xff]  }
 0x7ae   : > { %v1807_v31 = vpack.c.bf16 %v1801_v30, %v1801_v30  ;;  %v3269_v30 = vld [vmem:[%s3851_s8 + $0x10] sm:$0xff]  }
 0x7af   : > { %v3121_v32 = vpop.f32.mrf.mxu0 }
 0x7b0   : > { %v1830_v33 = vsel %vm1510_vm5, %v1807_v31, 0  ;;  %3222 = vmatprep.subr.msk.bf16.mxu1 %vm1510_vm5, %v1807_v31 }
 0x7b1   : > { %v1804_v35 = vpop.f32.mrf.mxu0  ;;  %3124 = vmatpush3.bf16.msra.mxu1 %v1830_v33 }
 0x7b2   : > { %3135 = vmatprep.subr.bf16.mxu1 %v3611_v48 }
 0x7b3   : > { %v3122_v36 = vpop.f32.mrf.mxu0 }
 0x7b4   : > { %3126 = vmatmul.mubr.msk.bf16.vlgmr.msra.gmra.mxu1 %vm1503_vm4, %v3263_v34 }
 0x7b5   : > { %3136 = vmatpush3.bf16.msra.mxu1 %v3611_v48 }
 0x7b6   : > { %3157 = vmatprep.subr.bf16.mxu1 %v3308_v1 }
 0x86c   : > { %v3115_v42 = vpop.f32.mrf.mxu1 }
 0x86d   : > { %v1756_v50 = vadd.f32 %v3115_v42, %v1625_v45 }
 0x86e   : > { %v1739_v43 = vpop.f32.mrf.mxu1 }
 0x86f   : > { %v1754_v54 = vadd.f32 %v1739_v43, %v1617_v49 }
 0x870   : > { %v3116_v44 = vpop.f32.mrf.mxu1 }
 0x871   : > { %v1757_v57 = vadd.f32 %v3116_v44, %v1628_v53 }
 0x872   : > { %v1742_v47 = vpop.f32.mrf.mxu1 }
 0x873   : > { %v1755_v61 = vadd.f32 %v1742_v47, %v1620_v56 }
 0x874   : > { %v3127_v52 = vpop.f32.mrf.mxu1 }
 0x875   : > { %v1883_v55 = vadd.f32 %v3127_v52, %v1756_v50 }
 0x876   : > { %v1866_v48 = vpop.f32.mrf.mxu1 }
 0x877   : > { %v1881_v58 = vadd.f32 %v1866_v48, %v1754_v54  ;;  %v1911_v62 = vadd.f32 %v1902_v59, %v1883_v55 }
 0x878   : > { %v3128_v60 = vpop.f32.mrf.mxu1 }
 0x879   : > { %v1884_v63 = vadd.f32 %v3128_v60, %v1757_v57  ;;  %v1909_v8 = vadd.f32 %v1892_v46, %v1881_v58  ;;  %v1915_v4 = vmax.f32 %v1911_v62, 0.0 }
 0x87a   : > { %v1869_v7 = vpop.f32.mrf.mxu1 }
 0x87b   : > { %v1912_v9 = vadd.f32 %v1907_v6, %v1884_v63  ;;  %v1882_v0 = vadd.f32 %v1869_v7, %v1755_v61  ;;  %v1913_v11 = vmax.f32 %v1909_v8, 0.0 }
 0x87d   : > { %v1916_v2 = vmax.f32 %v1912_v9, 0.0  ;;  %v1910_v5 = vadd.f32 %v1897_v51, %v1882_v0 }
 0x87f   : > { %v1918_v3 = vpack.c.bf16 %v1916_v2, %v1915_v4  ;;  %v1914_v12 = vmax.f32 %v1910_v5, 0.0  ;;  %v3270_v4 = vld [vmem:[%s3851_s8 + $0x30] sm:$0xff]  }
 0x881   : > { %v1917_v13 = vpack.c.bf16 %v1914_v12, %v1913_v11  ;;  %v3271_v12 = vld [vmem:[%s3851_s8 + $0x38] sm:$0xff]  }
 0x883   : > { %3131 = vmatprep.mubr.msk.bf16.mxu0 %vm390_vm1, %v1917_v13  ;;  %3137 = vmatprep.mubr.msk.bf16.mxu1 %vm390_vm1, %v1917_v13 }
 0x884   : > { %3132 = vmatmul.mubr.msk.bf16.vlgmr.msra.gmra.mxu0 %vm390_vm1, %v1918_v3  ;;  %3138 = vmatmul.mubr.msk.bf16.vlgmr.msra.gmra.mxu1 %vm390_vm1, %v1918_v3 }
 0x885   : > { %3145 = vmatprep.mubr.msk.bf16.mxu0 %vm3309_vm0, %v3308_v1  ;;  %3161 = vmatprep.mubr.msk.bf16.mxu1 %vm3309_vm0, %v3308_v1 }
 0x944   : > { %v3133_v14 = vpop.f32.mrf.mxu0  ;;  %v3139_v16 = vpop.f32.mrf.mxu1 }
 0x946   : > { %v1959_v17 = vpop.f32.mrf.mxu0  ;;  %v2016_v19 = vpop.f32.mrf.mxu1 }
 0x948   : > { %v3134_v20 = vpop.f32.mrf.mxu0  ;;  %v3140_v21 = vpop.f32.mrf.mxu1 }
 0x949   : > { %v1975_v22 = vpack.c.bf16 %v3134_v20, %v3133_v14  ;;  %v2032_v23 = vpack.c.bf16 %v3140_v21, %v3139_v16  ;;  %v3273_v14 = vld [vmem:[%s3851_s8 + $0x40] sm:$0xff]   ;;  %v3274_v16 = vld [vmem:[%s3851_s8 + $0x50] sm:$0xff]  }
 0x94a   : > { %v1962_v24 = vpop.f32.mrf.mxu0  ;;  %v2019_v40 = vpop.f32.mrf.mxu1 }
 0x94b   : > { %3142 = vmatpush3.bf16.msra.mxu0 %v2032_v23  ;;  %3158 = vmatpush3.bf16.msra.mxu1 %v1975_v22  ;;  %v1974_v25 = vpack.c.bf16 %v1962_v24, %v1959_v17  ;;  %v2031_v26 = vpack.c.bf16 %v2019_v40, %v2016_v19  ;;  %v3275_v17 = vld [vmem:[%s3851_s8 + $0x58] sm:$0xff]  }
 0x94c   : > { %3143 = vmatprep.subr.bf16.mxu0 %v3308_v1  ;;  %3159 = vmatprep.subr.bf16.mxu1 %v3308_v1 }
 0x94f   : > { %3144 = vmatpush3.bf16.msra.mxu0 %v2031_v26  ;;  %3160 = vmatpush3.bf16.msra.mxu1 %v1974_v25  ;;  %v2501_v25 = vpop.permute.xlu1 %2500 }
 0x950   : > { %3173 = vmatprep.subr.bf16.mxu0 %v3637_v15  ;;  %3179 = vmatprep.subr.bf16.mxu1 %v3308_v1 }
 0x952   : > { %3146 = vmatmul.mubr.msk.bf16.vlgmr.msra.gmra.mxu0 %vm1100_vm3, %v3264_v10  ;;  %3162 = vmatmul.mubr.msk.bf16.vlgmr.msra.gmra.mxu1 %vm1100_vm3, %v3265_v27 }
 0x953   : > { %3149 = vmatprep.mubr.msk.bf16.mxu0 %vm3309_vm0, %v3308_v1  ;;  %3165 = vmatprep.mubr.msk.bf16.mxu1 %vm3309_vm0, %v3308_v1 }
 0x954   : > { %3174 = vmatpush3.bf16.msra.mxu0 %v3637_v15  ;;  %v3268_v15 = vld [vmem:[%s3851_s8 + $0x28] sm:$0xff]  }
 0x955   : > { %3195 = vmatprep.subr.bf16.mxu0 %v3649_v18 }
 0x95a   : > { %3150 = vmatmul.mubr.msk.bf16.gmra.mxu0 %vm1100_vm3, %v3266_v28  ;;  %3166 = vmatmul.mubr.msk.bf16.gmra.mxu1 %vm1100_vm3, %v3267_v29 }
 0x95b   : > { %3153 = vmatprep.mubr.msk.bf16.mxu0 %vm3309_vm0, %v3308_v1  ;;  %3169 = vmatprep.mubr.msk.bf16.mxu1 %vm3309_vm0, %v3308_v1 }
 0x962   : > { %3154 = vmatmul.mubr.msk.bf16.gmra.mxu0 %vm1100_vm3, %v3268_v15  ;;  %3170 = vmatmul.mubr.msk.bf16.gmra.mxu1 %vm1100_vm3, %v3269_v30  ;;  %v2506_v30 = vpop.permute.xlu0 %2505 }
 0x963   : > { %3175 = vmatprep.mubr.msk.bf16.mxu0 %vm390_vm1, %v1917_v13  ;;  %3183 = vmatprep.mubr.msk.bf16.mxu1 %vm3309_vm0, %v3308_v1 }
 0x96a   : > { %3176 = vmatmul.mubr.msk.bf16.vlgmr.msra.gmra.mxu0 %vm390_vm1, %v1918_v3 }
 0x96b   : > { %3197 = vmatprep.mubr.msk.bf16.mxu0 %vm390_vm1, %v1917_v13  ;;  %3196 = vmatpush3.bf16.msra.mxu0 %v3649_v18  ;;  %v3272_v13 = vld [vmem:[%s3851_s8 + $0x48] sm:$0xff]  }
 0x96c   : > { %3201 = vmatprep.subr.bf16.mxu0 %v3308_v1 }
 0x972   : > { %3198 = vmatmul.mubr.msk.bf16.vlgmr.msra.gmra.mxu0 %vm390_vm1, %v1918_v3 }
 0x973   : > { %3205 = vmatprep.mubr.msk.bf16.mxu0 %vm3309_vm0, %v3308_v1 }
 0xa12   : > { %v2098_v31 = vpop.f32.mrf.mxu0  ;;  %v2179_v32 = vpop.f32.mrf.mxu1 }
 0xa13   : > { %v3738_v33 = vadd.f32 %v2179_v32, %v2098_v31 }
 0xa14   : > { %v3147_v34 = vpop.f32.mrf.mxu0  ;;  %v3163_v35 = vpop.f32.mrf.mxu1 }
 0xa16   : > { %v2101_v36 = vpop.f32.mrf.mxu0  ;;  %v2182_v37 = vpop.f32.mrf.mxu1 }
 0xa17   : > { %v3740_v38 = vadd.f32 %v2182_v37, %v2101_v36 }
 0xa18   : > { %v3148_v39 = vpop.f32.mrf.mxu0  ;;  %v3164_v41 = vpop.f32.mrf.mxu1 }
 0xa1a   : > { %v2106_v18 = vpop.f32.mrf.mxu0  ;;  %v2187_v42 = vpop.f32.mrf.mxu1 }
 0xa1b   : > { %v3742_v43 = vadd.f32 %v2187_v42, %v2106_v18  ;;  %v2511_v18 = vpop.permute.xlu1 %2510 }
 0xa1c   : > { %v3151_v44 = vpop.f32.mrf.mxu0  ;;  %v3167_v45 = vpop.f32.mrf.mxu1 }
 0xa1e   : > { %v2109_v46 = vpop.f32.mrf.mxu0  ;;  %v2190_v47 = vpop.f32.mrf.mxu1 }
 0xa1f   : > { %v3744_v49 = vadd.f32 %v2190_v47, %v2109_v46 }
 0xa20   : > { %v3152_v50 = vpop.f32.mrf.mxu0  ;;  %v3168_v51 = vpop.f32.mrf.mxu1 }
 0xa22   : > { %v2114_v52 = vpop.f32.mrf.mxu0  ;;  %v2195_v53 = vpop.f32.mrf.mxu1 }
 0xa23   : > { %v3746_v54 = vadd.f32 %v2195_v53, %v2114_v52 }
 0xa24   : > { %v3155_v55 = vpop.f32.mrf.mxu0  ;;  %v3171_v48 = vpop.f32.mrf.mxu1 }
 0xa25   : > { %v2516_v55 = vpop.permute.xlu0 %2515 }
 0xa26   : > { %v2117_v56 = vpop.f32.mrf.mxu0  ;;  %v2198_v57 = vpop.f32.mrf.mxu1 }
 0xa27   : > { %v3748_v58 = vadd.f32 %v2198_v57, %v2117_v56 }
 0xa28   : > { %v3156_v59 = vpop.f32.mrf.mxu0  ;;  %v3172_v60 = vpop.f32.mrf.mxu1 }
 0xa2a   : > { %v3177_v61 = vpop.f32.mrf.mxu0 }
 0xa2c   : > { %v2236_v62 = vpop.f32.mrf.mxu0 }
 0xa2e   : > { %v3178_v63 = vpop.f32.mrf.mxu0 }
 0xa2f   : > { %v2252_v6 = vpack.c.bf16 %v3178_v63, %v3177_v61 }
 0xa30   : > { %v2239_v7 = vpop.f32.mrf.mxu0 }
 0xa31   : > { %3180 = vmatpush3.bf16.msra.mxu1 %v2252_v6  ;;  %v2251_v9 = vpack.c.bf16 %v2239_v7, %v2236_v62 }
 0xa32   : > { %v3199_v8 = vpop.f32.mrf.mxu0  ;;  %3181 = vmatprep.subr.bf16.mxu1 %v3308_v1 }
 0xa34   : > { %v2381_v0 = vpop.f32.mrf.mxu0 }
 0xa35   : > { %3182 = vmatpush3.bf16.msra.mxu1 %v2251_v9 }
 0xa36   : > { %v3200_v2 = vpop.f32.mrf.mxu0 }
 0xa37   : > { %v2397_v5 = vpack.c.bf16 %v3200_v2, %v3199_v8  ;;  %v2521_v8 = vpop.permute.xlu1 %2520 }
 0xa38   : > { %3184 = vmatmul.mubr.msk.bf16.vlgmr.msra.gmra.mxu1 %vm1100_vm3, %v3270_v4  ;;  %v2384_v11 = vpop.f32.mrf.mxu0 }
 0xa39   : > { %3202 = vmatpush3.bf16.msra.mxu0 %v2397_v5  ;;  %3187 = vmatprep.mubr.msk.bf16.mxu1 %vm3309_vm0, %v3308_v1  ;;  %v2396_v3 = vpack.c.bf16 %v2384_v11, %v2381_v0 }
 0xa3a   : > { %3203 = vmatprep.subr.bf16.mxu0 %v3308_v1 }
 0xa3d   : > { %3204 = vmatpush3.bf16.msra.mxu0 %v2396_v3 }
 0xa40   : > { %3188 = vmatmul.mubr.msk.bf16.gmra.mxu1 %vm1100_vm3, %v3271_v12  ;;  %3206 = vmatmul.mubr.msk.bf16.vlgmr.msra.gmra.mxu0 %vm1100_vm3, %v3272_v13  ;;  %v2526_v12 = vpop.permute.xlu0 %2525 }
 0xa41   : > { %3191 = vmatprep.mubr.msk.bf16.mxu1 %vm3309_vm0, %v3308_v1  ;;  %3209 = vmatprep.mubr.msk.bf16.mxu0 %vm3309_vm0, %v3308_v1 }
 0xa48   : > { %3192 = vmatmul.mubr.msk.bf16.gmra.mxu1 %vm1100_vm3, %v3273_v14  ;;  %3210 = vmatmul.mubr.msk.bf16.gmra.mxu0 %vm1100_vm3, %v3274_v16 }
 0xa49   : > { %3213 = vmatprep.mubr.msk.bf16.mxu0 %vm3309_vm0, %v3308_v1 }
 0xa50   : > { %3214 = vmatmul.mubr.msk.bf16.gmra.mxu0 %vm1100_vm3, %v3275_v17 }
 0xaf8   : > { %v2318_v19 = vpop.f32.mrf.mxu1 }
 0xaf9   : > { %v2341_v23 = vadd.f32 %v2318_v19, %v3738_v33 }
 0xafa   : > { %v3185_v20 = vpop.f32.mrf.mxu1 }
 0xafc   : > { %v2321_v21 = vpop.f32.mrf.mxu1 }
 0xafd   : > { %v2342_v1 = vadd.f32 %v2321_v21, %v3740_v38 }
 0xafe   : > { %v3186_v22 = vpop.f32.mrf.mxu1 }
 0xb00   : > { %v2326_v24 = vpop.f32.mrf.mxu1  ;;  %v2463_v40 = vpop.f32.mrf.mxu0 }
 0xb01   : > { %v2486_v26 = vadd.f32 %v2463_v40, %v2341_v23  ;;  %v2343_v35 = vadd.f32 %v2326_v24, %v3742_v43 }
 0xb02   : > { %v3189_v10 = vpop.f32.mrf.mxu1  ;;  %v3207_v27 = vpop.f32.mrf.mxu0 }
 0xb03   : > { %v3786_v28 = vadd.f32 %v2501_v25, %v2486_v26 }
 0xb04   : > { %v2329_v29 = vpop.f32.mrf.mxu1  ;;  %v2466_v15 = vpop.f32.mrf.mxu0 }
 0xb05   : > { %vm2534_vm6 = vcmp.ge.f32.partialorder %v3786_v28, 0.0  ;;  %v2540_v31 = vsub.f32 0.0, %v3786_v28  ;;  %v2487_v32 = vadd.f32 %v2466_v15, %v2342_v1  ;;  %v2344_v43 = vadd.f32 %v2329_v29, %v3744_v49 }
 0xb06   : > { %v3190_v34 = vpop.f32.mrf.mxu1  ;;  %v3208_v33 = vpop.f32.mrf.mxu0 }
 0xb07   : > { %v2546_v36 = vsel %vm2534_vm6, %v2540_v31, %v3786_v28  ;;  %v3794_v37 = vadd.f32 %v2506_v30, %v2487_v32 }
 0xb08   : > { %v2552_v38 = vmul.f32 1.442695, %v2546_v36  ;;  %v2334_v39 = vpop.f32.mrf.mxu1  ;;  %v2471_v41 = vpop.f32.mrf.mxu0 }
 0xb09   : > { %vm2535_vm7 = vcmp.ge.f32.partialorder %v3794_v37, 0.0  ;;  %v2541_v42 = vsub.f32 0.0, %v3794_v37  ;;  %v2488_v44 = vadd.f32 %v2471_v41, %v2343_v35  ;;  %v2345_v49 = vadd.f32 %v2334_v39, %v3746_v54 }
 0xb0a   : > { %3276 = vpow2.f32 %v2552_v38  ;;  %v3193_v45 = vpop.f32.mrf.mxu1  ;;  %v3211_v46 = vpop.f32.mrf.mxu0 }
 0xb0b   : > { %v2547_v47 = vsel %vm2535_vm7, %v2541_v42, %v3794_v37  ;;  %v3802_v50 = vadd.f32 %v2511_v18, %v2488_v44 }
 0xb0c   : > { %v2554_v51 = vmul.f32 1.442695, %v2547_v47  ;;  %v2337_v52 = vpop.f32.mrf.mxu1  ;;  %v2474_v53 = vpop.f32.mrf.mxu0 }
 0xb0d   : > { %vm2536_vm8 = vcmp.ge.f32.partialorder %v3802_v50, 0.0  ;;  %v2542_v48 = vsub.f32 0.0, %v3802_v50  ;;  %v2489_v56 = vadd.f32 %v2474_v53, %v2344_v43  ;;  %v2346_v0 = vadd.f32 %v2337_v52, %v3748_v58 }
 0xb0e   : > { %3278 = vpow2.f32 %v2554_v51  ;;  %v3212_v57 = vpop.f32.mrf.mxu0  ;;  %v3194_v59 = vpop.f32.mrf.mxu1 }
 0xb0f   : > { %v2548_v60 = vsel %vm2536_vm8, %v2542_v48, %v3802_v50  ;;  %v3810_v61 = vadd.f32 %v2516_v55, %v2489_v56 }
 0xb10   : > { %v2556_v62 = vmul.f32 1.442695, %v2548_v60  ;;  %v2479_v63 = vpop.f32.mrf.mxu0 }
 0xb11   : > { %vm2537_vm9 = vcmp.ge.f32.partialorder %v3810_v61, 0.0  ;;  %v2543_v6 = vsub.f32 0.0, %v3810_v61  ;;  %v2490_v7 = vadd.f32 %v2479_v63, %v2345_v49 }
 0xb12   : > { %3280 = vpow2.f32 %v2556_v62  ;;  %v3215_v9 = vpop.f32.mrf.mxu0 }
 0xb13   : > { %v2549_v54 = vsel %vm2537_vm9, %v2543_v6, %v3810_v61  ;;  %v2532_v4 = vadd.f32 %v2521_v8, %v2490_v7 }
 0xb14   : > { %v2558_v2 = vmul.f32 1.442695, %v2549_v54  ;;  %v2482_v5 = vpop.f32.mrf.mxu0 }
 0xb15   : > { %vm2538_vm10 = vcmp.ge.f32.partialorder %v2532_v4, 0.0  ;;  %v2544_v11 = vsub.f32 0.0, %v2532_v4  ;;  %v2491_v3 = vadd.f32 %v2482_v5, %v2346_v0 }
 0xb16   : > { %3282 = vpow2.f32 %v2558_v2  ;;  %v3216_v13 = vpop.f32.mrf.mxu0 }
 0xb17   : > { %v3277_v14 = vpop.eup %3276  ;;  %v2550_v16 = vsel %vm2538_vm10, %v2544_v11, %v2532_v4  ;;  %v2533_v17 = vadd.f32 %v2526_v12, %v2491_v3 }
 0xb18   : > { %v2564_v19 = vadd.f32 1.0, %v3277_v14  ;;  %v2560_v58 = vmul.f32 1.442695, %v2550_v16 }
 0xb19   : > { %vm2539_vm11 = vcmp.ge.f32.partialorder %v2533_v17, 0.0  ;;  %v2545_v20 = vsub.f32 0.0, %v2533_v17 }
 0xb1a   : > { %3284 = vrcp.f32 %v2564_v19 }
 0xb1b   : > { %v3279_v21 = vpop.eup %3278  ;;  %3286 = vpow2.f32 %v2560_v58  ;;  %v2551_v22 = vsel %vm2539_vm11, %v2545_v20, %v2533_v17 }
 0xb1c   : > { %v2565_v23 = vadd.f32 1.0, %v3279_v21  ;;  %v2562_v24 = vmul.f32 1.442695, %v2551_v22 }
 0xb1e   : > { %3288 = vrcp.f32 %v2565_v23 }
 0xb1f   : > { %v3281_v40 = vpop.eup %3280  ;;  %3290 = vpow2.f32 %v2562_v24 }
 0xb20   : > { %v2566_v25 = vadd.f32 1.0, %v3281_v40 }
 0xb22   : > { %3292 = vrcp.f32 %v2566_v25 }
 0xb23   : > { %v3283_v26 = vpop.eup %3282 }
 0xb24   : > { %v2567_v10 = vadd.f32 1.0, %v3283_v26 }
 0xb26   : > { %3294 = vrcp.f32 %v2567_v10 }
 0xb27   : > { %v3285_v27 = vpop.eup %3284 }
 0xb28   : > { %v3287_v1 = vpop.eup %3286  ;;  %v2576_v29 = vmul.f32 %v3285_v27, %v3277_v14 }
 0xb29   : > { %v2568_v15 = vadd.f32 1.0, %v3287_v1 }
 0xb2a   : > { %v2582_v30 = vsel %vm2534_vm6, %v3285_v27, %v2576_v29 }
 0xb2b   : > { %v3289_v31 = vpop.eup %3288  ;;  %2588 = vst.msk [vmem:[%s359_s22] sm:$0xff] %vm390_vm1, %v2582_v30  ;;  %3296 = vrcp.f32 %v2568_v15 }
 0xb2c   : > { %v3291_v32 = vpop.eup %3290  ;;  %v2577_v34 = vmul.f32 %v3289_v31, %v3279_v21 }
 0xb2d   : > { %v2569_v33 = vadd.f32 1.0, %v3291_v32 }
 0xb2e   : > { %v2583_v35 = vsel %vm2535_vm7, %v3289_v31, %v2577_v34 }
 0xb2f   : > { %v3293_v36 = vpop.eup %3292  ;;  %2589 = vst.msk [vmem:[%s359_s22 + $0x8] sm:$0xff] %vm390_vm1, %v2583_v35  ;;  %3298 = vrcp.f32 %v2569_v33 }
 0xb30   : > { %v2578_v38 = vmul.f32 %v3293_v36, %v3281_v40 }
 0xb32   : > { %v2584_v39 = vsel %vm2536_vm8, %v3293_v36, %v2578_v38 }
 0xb33   : > { %v3295_v28 = vpop.eup %3294  ;;  %2590 = vst.msk [vmem:[%s359_s22 + $0x10] sm:$0xff] %vm390_vm1, %v2584_v39 }
 0xb34   : > { %v2579_v41 = vmul.f32 %v3295_v28, %v3283_v26 }
 0xb36   : > { %v2585_v18 = vsel %vm2537_vm9, %v3295_v28, %v2579_v41 }
 0xb37   : > { %2591 = vst.msk [vmem:[%s359_s22 + $0x18] sm:$0xff] %vm390_vm1, %v2585_v18 }
 0xb38   : > { %v3297_v42 = vpop.eup %3296 }
 0xb39   : > { %v2580_v37 = vmul.f32 %v3297_v42, %v3287_v1 }
 0xb3b   : > { %v2586_v44 = vsel %vm2538_vm10, %v3297_v42, %v2580_v37 }
 0xb3c   : > { %v3299_v45 = vpop.eup %3298  ;;  %2592 = vst.msk [vmem:[%s359_s22 + $0x20] sm:$0xff] %vm390_vm1, %v2586_v44 }
 0xb3d   : > { %v2581_v46 = vmul.f32 %v3299_v45, %v3291_v32 }
 0xb3f   : > { %v2587_v43 = vsel %vm2539_vm11, %v3299_v45, %v2581_v46 }
 0xb40   : > { %2593 = vst.msk [vmem:[%s359_s22 + $0x28] sm:$0xff] %vm390_vm1, %v2587_v43 }
 0xb41 PF: > { %s20_s13 = sadd.s32 1, %s3306_s13  }
 0xb42   : > { %p17_p4 = scmp.ge.s32.totalorder %s20_s13, 4  }
 0xb44   :  { %19 = sbr.rel (!%p17_p4) target bundleno = 1 (0x1), region = 108 }

</bundles_post_ra>
